<compile_context>
chip_gen: v6e
topology: v6e:2x2x1
jax: 0.10.0
libtpu: 0.0.40
codegen_flags: <defaults>
</compile_context>

<pallas_src>
import jax
import jax.numpy as jnp
from jax.experimental import pallas as pl
from jax.experimental.pallas import tpu as pltpu

# logical (PyTorch) dims
D_IN, D_H, D_Z = 784, 400, 20
# lane-aligned padded dims used inside the kernel (input/output feature dim stays 784)
D_HP, D_ZP = 512, 128


def _round_up(x, m):
    return (x + m - 1) // m * m


def _pad2(a, rows, cols):
    r, c = a.shape
    return jnp.pad(a, ((0, rows - r), (0, cols - c)))


def vae_kernel(x_ref, eps_ref,
               w1_ref, b1_ref,
               wh_ref, bh_ref,          # fused [w21 | w22], [b21 | b22]
               w3_ref, b3_ref,
               w4_ref, b4_ref,
               recon_ref, mu_ref, logvar_ref):
    # encode: h1 = relu(fc1(x)); x arrives as bf16 (TB, 784)
    h1 = jnp.dot(x_ref[...], w1_ref[...],
                 preferred_element_type=jnp.float32) + b1_ref[...]
    h1 = jnp.maximum(h1, 0.0).astype(jnp.bfloat16)                        # (TB, 512)

    # fused mu/logvar head: one (512, 256) matmul, split on a lane-aligned boundary
    head = jnp.dot(h1, wh_ref[...],
                   preferred_element_type=jnp.float32) + bh_ref[...]
    mu = head[:, :D_ZP]                                                   # (TB, 128) f32
    logvar = head[:, D_ZP:]                                               # (TB, 128) f32

    # reparameterize (training path): z = eps * exp(0.5 * logvar) + mu   (f32 elementwise)
    std = jnp.exp(0.5 * logvar)
    z = eps_ref[...].astype(jnp.float32) * std + mu

    # decode: h3 = relu(fc3(z)); recon = sigmoid(fc4(h3))
    h3 = jnp.dot(z.astype(jnp.bfloat16), w3_ref[...],
                 preferred_element_type=jnp.float32) + b3_ref[...]
    h3 = jnp.maximum(h3, 0.0).astype(jnp.bfloat16)                        # (TB, 512)
    logits = jnp.dot(h3, w4_ref[...],
                     preferred_element_type=jnp.float32) + b4_ref[...]    # (TB, 784)

    recon_ref[...] = jax.nn.sigmoid(logits).astype(recon_ref.dtype)
    mu_ref[...] = mu.astype(mu_ref.dtype)
    logvar_ref[...] = logvar.astype(logvar_ref.dtype)


def init_params(key):
    """PyTorch-layout params: weights stored transposed as (in, out) f32, biases (out,) f32."""
    def linear(key, fan_in, fan_out):
        kw, kb = jax.random.split(key)
        bound = 1.0 / jnp.sqrt(fan_in)
        w = jax.random.uniform(kw, (fan_in, fan_out), jnp.float32, -bound, bound)
        b = jax.random.uniform(kb, (fan_out,), jnp.float32, -bound, bound)
        return w, b

    k1, k2, k3, k4, k5 = jax.random.split(key, 5)
    w1, b1 = linear(k1, D_IN, D_H)      # fc1
    w21, b21 = linear(k2, D_H, D_Z)     # fc21
    w22, b22 = linear(k3, D_H, D_Z)     # fc22
    w3, b3 = linear(k4, D_Z, D_H)       # fc3
    w4, b4 = linear(k5, D_H, D_IN)      # fc4
    return (w1, b1, w21, b21, w22, b22, w3, b3, w4, b4)


def pack_params(raw):
    """Pad hidden/latent dims to lane-aligned shapes, fuse the mu/logvar head, cast to bf16.

    Zero-padding invariants the kernel relies on:
      * w1 pad cols / b1 pad = 0  => h1 pad lanes = 0
      * wh pad rows+cols / bh pad = 0 => mu/logvar pad lanes = 0 (so std pad = 1)
      * w3 pad rows = 0 => z pad lanes never reach h3; b3/w4 pads = 0 likewise.
    """
    w1, b1, w21, b21, w22, b22, w3, b3, w4, b4 = raw

    w1p = _pad2(w1, D_IN, D_HP).astype(jnp.bfloat16)                     # (784, 512)
    b1p = _pad2(b1.reshape(1, -1), 1, D_HP)                              # (1, 512) f32

    w21p = _pad2(w21, D_HP, D_ZP)
    w22p = _pad2(w22, D_HP, D_ZP)
    whp = jnp.concatenate([w21p, w22p], axis=1).astype(jnp.bfloat16)     # (512, 256)
    bhp = jnp.concatenate([_pad2(b21.reshape(1, -1), 1, D_ZP),
                           _pad2(b22.reshape(1, -1), 1, D_ZP)], axis=1)  # (1, 256) f32

    w3p = _pad2(w3, D_ZP, D_HP).astype(jnp.bfloat16)                     # (128, 512)
    b3p = _pad2(b3.reshape(1, -1), 1, D_HP)                              # (1, 512) f32
    w4p = w4.astype(jnp.bfloat16)                                        # (400->512 rows padded)
    w4p = _pad2(w4, D_HP, D_IN).astype(jnp.bfloat16)                     # (512, 784)
    b4p = b4.reshape(1, -1)                                              # (1, 784) f32

    return (w1p, b1p, whp, bhp, w3p, b3p, w4p, b4p)


def _choose_tile(B, tile_b):
    tile_b = min(tile_b, _round_up(B, 8))
    # Keep >= 2 grid steps once tiles would still be >= ~128 rows, so the 'parallel'
    # batch axis can shard across v7x's two TensorCores (near-neutral on v5e/v6e).
    if B >= 256:
        tile_b = min(tile_b, _round_up((B + 1) // 2, 8))
    return max(tile_b, 8)


def vae_forward(x_nchw, eps, packed_params, *, tile_b=256, recon_dtype=jnp.bfloat16):
    """Forward pass. Returns (recon[B,784] (recon_dtype), mu[B,20] f32, logvar[B,20] f32).

    Pass recon_dtype=jnp.float32 for exact PyTorch output dtype; bf16 halves the dominant
    HBM stream and is plenty for a downstream BCE loss.
    """
    B = x_nchw.shape[0]
    x = x_nchw.reshape(B, D_IN)                       # x.view(-1, 784)
    if x.dtype != jnp.bfloat16:
        x = x.astype(jnp.bfloat16)
    if eps.dtype != jnp.bfloat16:
        eps = eps.astype(jnp.bfloat16)

    tile_b = _choose_tile(B, tile_b)
    Bp = _round_up(B, tile_b)

    # Pad only when needed (wrapper pads/slices are separate HBM round-trips).
    pad_b = Bp - B
    pad_z = D_ZP - eps.shape[1]
    if pad_b:
        x = jnp.pad(x, ((0, pad_b), (0, 0)))
    if pad_b or pad_z:
        # eps pad lanes are harmless: they only feed z pad lanes, which hit zero rows of w3.
        eps = jnp.pad(eps, ((0, pad_b), (0, pad_z)))

    (w1p, b1p, whp, bhp, w3p, b3p, w4p, b4p) = packed_params

    def bmap(i):          # batch-tiled activations
        return (i, 0)

    def wmap(i):          # grid-invariant weights / biases (constant index map => no re-DMA)
        return (0, 0)

    grid = (Bp // tile_b,)

    in_specs = [
        pl.BlockSpec((tile_b, D_IN), bmap),           # x  (bf16, full 784 lanes)
        pl.BlockSpec((tile_b, D_ZP), bmap),           # eps (bf16)
        pl.BlockSpec((D_IN, D_HP), wmap),             # w1
        pl.BlockSpec((1, D_HP), wmap),                # b1
        pl.BlockSpec((D_HP, 2 * D_ZP), wmap),         # fused head weight
        pl.BlockSpec((1, 2 * D_ZP), wmap),            # fused head bias
        pl.BlockSpec((D_ZP, D_HP), wmap),             # w3
        pl.BlockSpec((1, D_HP), wmap),                # b3
        pl.BlockSpec((D_HP, D_IN), wmap),             # w4
        pl.BlockSpec((1, D_IN), wmap),                # b4
    ]
    out_specs = [
        pl.BlockSpec((tile_b, D_IN), bmap),           # recon (full 784 lanes, no slice needed)
        pl.BlockSpec((tile_b, D_ZP), bmap),           # mu (padded to 128 lanes)
        pl.BlockSpec((tile_b, D_ZP), bmap),           # logvar (padded to 128 lanes)
    ]
    out_shape = [
        jax.ShapeDtypeStruct((Bp, D_IN), recon_dtype),
        jax.ShapeDtypeStruct((Bp, D_ZP), jnp.float32),
        jax.ShapeDtypeStruct((Bp, D_ZP), jnp.float32),
    ]

    flops = 2 * Bp * (D_IN * D_HP + D_HP * (2 * D_ZP) + D_ZP * D_HP + D_HP * D_IN)
    transcendentals = Bp * (D_ZP + D_IN)              # exp(0.5*logvar) + sigmoid
    weight_bytes = sum(int(p.size) * p.dtype.itemsize for p in packed_params)
    bytes_accessed = ((Bp * D_IN + Bp * D_ZP) * 2      # bf16 x + eps in
                      + weight_bytes
                      + Bp * D_IN * jnp.dtype(recon_dtype).itemsize   # recon out
                      + 2 * Bp * D_ZP * 4)                            # mu/logvar out (f32)

    recon_p, mu_p, logvar_p = pl.pallas_call(
        vae_kernel,
        grid_spec=pltpu.PrefetchScalarGridSpec(
            num_scalar_prefetch=0,
            grid=grid,
            in_specs=in_specs,
            out_specs=out_specs,
        ),
        out_shape=out_shape,
        compiler_params=pltpu.CompilerParams(
            dimension_semantics=("parallel",),
            vmem_limit_bytes=32 * 1024 * 1024,
        ),
        cost_estimate=pl.CostEstimate(
            flops=flops,
            transcendentals=transcendentals,
            bytes_accessed=bytes_accessed,
        ),
    )(x, eps, w1p, b1p, whp, bhp, w3p, b3p, w4p, b4p)

    # Strip batch padding only if it was added; recon needs no lane slice (true 784 width).
    if pad_b:
        recon_p = recon_p[:B]
        mu_p = mu_p[:B]
        logvar_p = logvar_p[:B]
    return recon_p, mu_p[:, :D_Z], logvar_p[:, :D_Z]


def vae_reference(x_nchw, eps, raw_params, *, mirror_bf16=True):
    """Pure-JAX reference of the PyTorch forward (training-mode reparameterize).

    With mirror_bf16=True, weights and matmul inputs (and eps) are rounded through bf16 at
    the same points as the kernel, isolating kernel math from quantization error.
    """
    w1, b1, w21, b21, w22, b22, w3, b3, w4, b4 = raw_params

    def cast(a):
        return a.astype(jnp.bfloat16).astype(jnp.float32) if mirror_bf16 else a

    x = x_nchw.reshape(x_nchw.shape[0], D_IN)
    h1 = jax.nn.relu(cast(x) @ cast(w1) + b1)
    mu = cast(h1) @ cast(w21) + b21
    logvar = cast(h1) @ cast(w22) + b22
    z = cast(eps) * jnp.exp(0.5 * logvar) + mu
    h3 = jax.nn.relu(cast(z) @ cast(w3) + b3)
    recon = jax.nn.sigmoid(cast(h3) @ cast(w4) + b4)
    return recon, mu, logvar


if __name__ == "__main__":
    key = jax.random.PRNGKey(0)
    kp, kx, ke = jax.random.split(key, 3)

    B = 8                                    # small MNIST-like batch
    raw_params = init_params(kp)
    packed_params = pack_params(raw_params)

    x = jax.random.uniform(kx, (B, 1, 28, 28), jnp.float32)     # NCHW input
    # eps for the reparameterization trick; drawn in the JAX wrapper so the kernel stays
    # deterministic (PyTorch uses torch.randn_like here).
    # TODO(synk): could instead draw eps in-kernel via pltpu.prng_seed/stateful_normal to
    # drop the eps input stream, at the cost of bit-exact parity with wrapper RNG.
    eps = jax.random.normal(ke, (B, D_Z), jnp.float32)

    recon, mu, logvar = jax.block_until_ready(vae_forward(x, eps, packed_params))
    recon_f32 = recon.astype(jnp.float32)

    # tight check against a reference with matching bf16 rounding points
    r_recon, r_mu, r_logvar = vae_reference(x, eps, raw_params, mirror_bf16=True)
    assert recon.shape == (B, D_IN) and mu.shape == (B, D_Z) and logvar.shape == (B, D_Z)
    assert jnp.allclose(recon_f32, r_recon, atol=1e-2, rtol=2e-2)
    assert jnp.allclose(mu, r_mu, atol=4e-3, rtol=4e-3)
    assert jnp.allclose(logvar, r_logvar, atol=4e-3, rtol=4e-3)

    # looser sanity check against the pure-f32 PyTorch-equivalent forward
    f_recon, f_mu, f_logvar = vae_reference(x, eps, raw_params, mirror_bf16=False)
    assert jnp.allclose(recon_f32, f_recon, atol=5e-2, rtol=5e-2)
    assert jnp.allclose(mu, f_mu, atol=5e-2, rtol=5e-2)
    assert jnp.allclose(logvar, f_logvar, atol=5e-2, rtol=5e-2)

    print("KERNEL_OK")
</pallas_src>

<mosaic_0001>
module attributes {stable_mosaic.version = 11 : i64} {
  func.func @vae_kernel(%arg0: i32, %arg1: memref<8x784xbf16, #tpu.memory_space<vmem>>, %arg2: memref<8x128xbf16, #tpu.memory_space<vmem>>, %arg3: memref<784x512xbf16, #tpu.memory_space<vmem>>, %arg4: memref<1x512xf32, #tpu.memory_space<vmem>>, %arg5: memref<512x256xbf16, #tpu.memory_space<vmem>>, %arg6: memref<1x256xf32, #tpu.memory_space<vmem>>, %arg7: memref<128x512xbf16, #tpu.memory_space<vmem>>, %arg8: memref<1x512xf32, #tpu.memory_space<vmem>>, %arg9: memref<512x784xbf16, #tpu.memory_space<vmem>>, %arg10: memref<1x784xf32, #tpu.memory_space<vmem>>, %arg11: memref<8x784xbf16, #tpu.memory_space<vmem>>, %arg12: memref<8x128xf32, #tpu.memory_space<vmem>>, %arg13: memref<8x128xf32, #tpu.memory_space<vmem>>) attributes {dimension_semantics = [#tpu.dimension_semantics<parallel>], iteration_bounds = array<i64: 1>, scalar_prefetch = 0 : i64, scratch_operands = 0 : i64, tpu.core_type = #tpu.core_type<tc>, window_params = [{transform_indices = @transform_0, window_bounds = array<i64: 8, 784>}, {transform_indices = @transform_1, window_bounds = array<i64: 8, 128>}, {pipeline_mode = #tpu.pipeline_mode<synchronous>, transform_indices = @transform_2, window_bounds = array<i64: 784, 512>}, {pipeline_mode = #tpu.pipeline_mode<synchronous>, transform_indices = @transform_3, window_bounds = array<i64: 1, 512>}, {pipeline_mode = #tpu.pipeline_mode<synchronous>, transform_indices = @transform_4, window_bounds = array<i64: 512, 256>}, {pipeline_mode = #tpu.pipeline_mode<synchronous>, transform_indices = @transform_5, window_bounds = array<i64: 1, 256>}, {pipeline_mode = #tpu.pipeline_mode<synchronous>, transform_indices = @transform_6, window_bounds = array<i64: 128, 512>}, {pipeline_mode = #tpu.pipeline_mode<synchronous>, transform_indices = @transform_7, window_bounds = array<i64: 1, 512>}, {pipeline_mode = #tpu.pipeline_mode<synchronous>, transform_indices = @transform_8, window_bounds = array<i64: 512, 784>}, {pipeline_mode = #tpu.pipeline_mode<synchronous>, transform_indices = @transform_9, window_bounds = array<i64: 1, 784>}, {transform_indices = @transform_10, window_bounds = array<i64: 8, 784>}, {transform_indices = @transform_11, window_bounds = array<i64: 8, 128>}, {transform_indices = @transform_12, window_bounds = array<i64: 8, 128>}]} {
    %c0 = arith.constant 0 : index
    %c0_0 = arith.constant 0 : index
    %0 = vector.load %arg1[%c0, %c0_0] : memref<8x784xbf16, #tpu.memory_space<vmem>>, vector<8x784xbf16>
    %c0_1 = arith.constant 0 : index
    %c0_2 = arith.constant 0 : index
    %1 = vector.load %arg3[%c0_1, %c0_2] : memref<784x512xbf16, #tpu.memory_space<vmem>>, vector<784x512xbf16>
    %cst = arith.constant dense<0.000000e+00> : vector<8x512xf32>
    %2 = tpu.matmul %0, %1, %cst {dimension_numbers = #tpu.dot_dimension_numbers<[1], [0], [0], [1], [0, 0, 1, 1], [], []>} : vector<8x784xbf16>, vector<784x512xbf16>, vector<8x512xf32> -> vector<8x512xf32>
    %c0_3 = arith.constant 0 : index
    %c0_4 = arith.constant 0 : index
    %3 = vector.load %arg4[%c0_3, %c0_4] : memref<1x512xf32, #tpu.memory_space<vmem>>, vector<1x512xf32>
    %4 = vector.broadcast %3 : vector<1x512xf32> to vector<8x512xf32>
    %5 = arith.addf %2, %4 : vector<8x512xf32>
    %cst_5 = arith.constant 0.000000e+00 : f32
    %6 = vector.broadcast %cst_5 : f32 to vector<8x512xf32>
    %7 = arith.maximumf %5, %6 : vector<8x512xf32>
    %8 = arith.truncf %7 : vector<8x512xf32> to vector<8x512xbf16>
    %c0_6 = arith.constant 0 : index
    %c0_7 = arith.constant 0 : index
    %9 = vector.load %arg5[%c0_6, %c0_7] : memref<512x256xbf16, #tpu.memory_space<vmem>>, vector<512x256xbf16>
    %cst_8 = arith.constant dense<0.000000e+00> : vector<8x256xf32>
    %10 = tpu.matmul %8, %9, %cst_8 {dimension_numbers = #tpu.dot_dimension_numbers<[1], [0], [0], [1], [0, 0, 1, 1], [], []>} : vector<8x512xbf16>, vector<512x256xbf16>, vector<8x256xf32> -> vector<8x256xf32>
    %c0_9 = arith.constant 0 : index
    %c0_10 = arith.constant 0 : index
    %11 = vector.load %arg6[%c0_9, %c0_10] : memref<1x256xf32, #tpu.memory_space<vmem>>, vector<1x256xf32>
    %12 = vector.broadcast %11 : vector<1x256xf32> to vector<8x256xf32>
    %13 = arith.addf %10, %12 : vector<8x256xf32>
    %14 = vector.extract_strided_slice %13 {offsets = [0, 0], sizes = [8, 128], strides = [1, 1]} : vector<8x256xf32> to vector<8x128xf32>
    %15 = vector.extract_strided_slice %13 {offsets = [0, 128], sizes = [8, 128], strides = [1, 1]} : vector<8x256xf32> to vector<8x128xf32>
    %cst_11 = arith.constant 5.000000e-01 : f32
    %16 = vector.broadcast %cst_11 : f32 to vector<8x128xf32>
    %17 = arith.mulf %16, %15 : vector<8x128xf32>
    %18 = math.exp %17 : vector<8x128xf32>
    %c0_12 = arith.constant 0 : index
    %c0_13 = arith.constant 0 : index
    %19 = vector.load %arg2[%c0_12, %c0_13] : memref<8x128xbf16, #tpu.memory_space<vmem>>, vector<8x128xbf16>
    %20 = arith.extf %19 : vector<8x128xbf16> to vector<8x128xf32>
    %21 = arith.mulf %20, %18 : vector<8x128xf32>
    %22 = arith.addf %21, %14 : vector<8x128xf32>
    %23 = arith.truncf %22 : vector<8x128xf32> to vector<8x128xbf16>
    %c0_14 = arith.constant 0 : index
    %c0_15 = arith.constant 0 : index
    %24 = vector.load %arg7[%c0_14, %c0_15] : memref<128x512xbf16, #tpu.memory_space<vmem>>, vector<128x512xbf16>
    %cst_16 = arith.constant dense<0.000000e+00> : vector<8x512xf32>
    %25 = tpu.matmul %23, %24, %cst_16 {dimension_numbers = #tpu.dot_dimension_numbers<[1], [0], [0], [1], [0, 0, 1, 1], [], []>} : vector<8x128xbf16>, vector<128x512xbf16>, vector<8x512xf32> -> vector<8x512xf32>
    %c0_17 = arith.constant 0 : index
    %c0_18 = arith.constant 0 : index
    %26 = vector.load %arg8[%c0_17, %c0_18] : memref<1x512xf32, #tpu.memory_space<vmem>>, vector<1x512xf32>
    %27 = vector.broadcast %26 : vector<1x512xf32> to vector<8x512xf32>
    %28 = arith.addf %25, %27 : vector<8x512xf32>
    %cst_19 = arith.constant 0.000000e+00 : f32
    %29 = vector.broadcast %cst_19 : f32 to vector<8x512xf32>
    %30 = arith.maximumf %28, %29 : vector<8x512xf32>
    %31 = arith.truncf %30 : vector<8x512xf32> to vector<8x512xbf16>
    %c0_20 = arith.constant 0 : index
    %c0_21 = arith.constant 0 : index
    %32 = vector.load %arg9[%c0_20, %c0_21] : memref<512x784xbf16, #tpu.memory_space<vmem>>, vector<512x784xbf16>
    %cst_22 = arith.constant dense<0.000000e+00> : vector<8x784xf32>
    %33 = tpu.matmul %31, %32, %cst_22 {dimension_numbers = #tpu.dot_dimension_numbers<[1], [0], [0], [1], [0, 0, 1, 1], [], []>} : vector<8x512xbf16>, vector<512x784xbf16>, vector<8x784xf32> -> vector<8x784xf32>
    %c0_23 = arith.constant 0 : index
    %c0_24 = arith.constant 0 : index
    %34 = vector.load %arg10[%c0_23, %c0_24] : memref<1x784xf32, #tpu.memory_space<vmem>>, vector<1x784xf32>
    %35 = vector.broadcast %34 : vector<1x784xf32> to vector<8x784xf32>
    %36 = arith.addf %33, %35 : vector<8x784xf32>
    %37 = arith.negf %36 : vector<8x784xf32>
    %38 = math.exp %37 : vector<8x784xf32>
    %cst_25 = arith.constant 1.000000e+00 : f32
    %39 = vector.broadcast %cst_25 : f32 to vector<8x784xf32>
    %40 = arith.addf %39, %38 : vector<8x784xf32>
    %41 = arith.divf %39, %40 : vector<8x784xf32>
    %42 = arith.truncf %41 : vector<8x784xf32> to vector<8x784xbf16>
    %c0_26 = arith.constant 0 : index
    %c0_27 = arith.constant 0 : index
    %43 = vector.load %arg11[%c0_26, %c0_27] : memref<8x784xbf16, #tpu.memory_space<vmem>>, vector<8x784xbf16>
    tpu.vector_store %arg11[%c0_26, %c0_27], %42 {strides = array<i32>} : memref<8x784xbf16, #tpu.memory_space<vmem>>, vector<8x784xbf16>,
    %c0_28 = arith.constant 0 : index
    %c0_29 = arith.constant 0 : index
    %44 = vector.load %arg12[%c0_28, %c0_29] : memref<8x128xf32, #tpu.memory_space<vmem>>, vector<8x128xf32>
    tpu.vector_store %arg12[%c0_28, %c0_29], %14 {strides = array<i32>} : memref<8x128xf32, #tpu.memory_space<vmem>>, vector<8x128xf32>,
    %c0_30 = arith.constant 0 : index
    %c0_31 = arith.constant 0 : index
    %45 = vector.load %arg13[%c0_30, %c0_31] : memref<8x128xf32, #tpu.memory_space<vmem>>, vector<8x128xf32>
    tpu.vector_store %arg13[%c0_30, %c0_31], %15 {strides = array<i32>} : memref<8x128xf32, #tpu.memory_space<vmem>>, vector<8x128xf32>,
    return
  }
  func.func @transform_0(%arg0: i32) -> (i32, i32) {
    %c0_i32 = arith.constant 0 : i32
    %c0_i32_0 = arith.constant 0 : i32
    return %arg0, %c0_i32 : i32, i32
  }
  func.func @transform_1(%arg0: i32) -> (i32, i32) {
    %c0_i32 = arith.constant 0 : i32
    %c0_i32_0 = arith.constant 0 : i32
    return %arg0, %c0_i32 : i32, i32
  }
  func.func @transform_2(%arg0: i32) -> (i32, i32) {
    %c0_i32 = arith.constant 0 : i32
    %c0_i32_0 = arith.constant 0 : i32
    %c0_i32_1 = arith.constant 0 : i32
    return %c0_i32, %c0_i32_0 : i32, i32
  }
  func.func @transform_3(%arg0: i32) -> (i32, i32) {
    %c0_i32 = arith.constant 0 : i32
    %c0_i32_0 = arith.constant 0 : i32
    %c0_i32_1 = arith.constant 0 : i32
    return %c0_i32, %c0_i32_0 : i32, i32
  }
  func.func @transform_4(%arg0: i32) -> (i32, i32) {
    %c0_i32 = arith.constant 0 : i32
    %c0_i32_0 = arith.constant 0 : i32
    %c0_i32_1 = arith.constant 0 : i32
    return %c0_i32, %c0_i32_0 : i32, i32
  }
  func.func @transform_5(%arg0: i32) -> (i32, i32) {
    %c0_i32 = arith.constant 0 : i32
    %c0_i32_0 = arith.constant 0 : i32
    %c0_i32_1 = arith.constant 0 : i32
    return %c0_i32, %c0_i32_0 : i32, i32
  }
  func.func @transform_6(%arg0: i32) -> (i32, i32) {
    %c0_i32 = arith.constant 0 : i32
    %c0_i32_0 = arith.constant 0 : i32
    %c0_i32_1 = arith.constant 0 : i32
    return %c0_i32, %c0_i32_0 : i32, i32
  }
  func.func @transform_7(%arg0: i32) -> (i32, i32) {
    %c0_i32 = arith.constant 0 : i32
    %c0_i32_0 = arith.constant 0 : i32
    %c0_i32_1 = arith.constant 0 : i32
    return %c0_i32, %c0_i32_0 : i32, i32
  }
  func.func @transform_8(%arg0: i32) -> (i32, i32) {
    %c0_i32 = arith.constant 0 : i32
    %c0_i32_0 = arith.constant 0 : i32
    %c0_i32_1 = arith.constant 0 : i32
    return %c0_i32, %c0_i32_0 : i32, i32
  }
  func.func @transform_9(%arg0: i32) -> (i32, i32) {
    %c0_i32 = arith.constant 0 : i32
    %c0_i32_0 = arith.constant 0 : i32
    %c0_i32_1 = arith.constant 0 : i32
    return %c0_i32, %c0_i32_0 : i32, i32
  }
  func.func @transform_10(%arg0: i32) -> (i32, i32) {
    %c0_i32 = arith.constant 0 : i32
    %c0_i32_0 = arith.constant 0 : i32
    return %arg0, %c0_i32 : i32, i32
  }
  func.func @transform_11(%arg0: i32) -> (i32, i32) {
    %c0_i32 = arith.constant 0 : i32
    %c0_i32_0 = arith.constant 0 : i32
    return %arg0, %c0_i32 : i32, i32
  }
  func.func @transform_12(%arg0: i32) -> (i32, i32) {
    %c0_i32 = arith.constant 0 : i32
    %c0_i32_0 = arith.constant 0 : i32
    return %arg0, %c0_i32 : i32, i32
  }
}

</mosaic_0001>

<bundles_post_ra>
// kernel: tpu_custom_call.1
= control target key start
LH: loop header
LB: loop body
LE: loop exit
PB: predicated region body
PF: predicated region fallthrough
CT: control target
= control target key end

     0   :  { %18 = vsyncpa [#allocation3], 0  ;;  %vm1267_vm0 = vcmask 130048   ;;  %s7491_s0 = inlined_call_operand.vmem [shape: bf16[8,784], index: 0, kind: input, shape index: {}]   ;;  %s7492_s1 = inlined_call_operand.vmem [shape: bf16[8,128], index: 1, kind: input, shape index: {}]   ;;  %s7493_s2 = inlined_call_operand.vmem [shape: bf16[784,512], index: 2, kind: input, shape index: {}]   ;;  %s7494_s3 = inlined_call_operand.vmem [shape: f32[1,512], index: 3, kind: input, shape index: {}]   ;;  %s7495_s4 = inlined_call_operand.vmem [shape: bf16[512,256], index: 4, kind: input, shape index: {}]   ;;  %s7496_s5 = inlined_call_operand.vmem [shape: f32[1,256], index: 5, kind: input, shape index: {}]   ;;  %s7497_s6 = inlined_call_operand.vmem [shape: bf16[128,512], index: 6, kind: input, shape index: {}]   ;;  %s7498_s7 = inlined_call_operand.vmem [shape: f32[1,512], index: 7, kind: input, shape index: {}]   ;;  %s7499_s8 = inlined_call_operand.vmem [shape: bf16[512,784], index: 8, kind: input, shape index: {}]   ;;  %s7500_s9 = inlined_call_operand.vmem [shape: f32[1,784], index: 9, kind: input, shape index: {}]   ;;  %s7501_s10 = inlined_call_operand.hbm [shape: bf16[8,784], index: 10, kind: output, shape index: {0}]   ;;  %s7502_s11 = inlined_call_operand.hbm [shape: f32[8,128], index: 11, kind: output, shape index: {1}]   ;;  %s7503_s12 = inlined_call_operand.hbm [shape: f32[8,128], index: 12, kind: output, shape index: {2}]  }
   0x1   :  { %v4875_v0 = vld [vmem:[%s7493_s2 + $0xe4] ss:$16 sps:$4 sm:$0xff]   ;;  %v4879_v2 = vld [vmem:[%s7493_s2 + $0xe0] ss:$16 sps:$4 sm:$0xff]   ;;  %v42_v48 = vld [vmem:[%s7491_s0 + $0x8] sm:$0xff] }
   0x2   :  { %v4877_v1 = vld [vmem:[%s7493_s2 + $0x2e4] ss:$16 sps:$4 sm:$0xff]   ;;  %1271 = vmatprep.subr.bf16.mxu0 %v4875_v0  ;;  %v4880_v3 = vld [vmem:[%s7493_s2 + $0x2e0] ss:$16 sps:$4 sm:$0xff]   ;;  %v5956_v51 = vcombine.high %v42_v48, %v42_v48 }
   0x3   :  { %1312 = vmatprep.subr.bf16.mxu1 %v4877_v1  ;;  %v4881_v4 = vld [vmem:[%s7493_s2 + $0xc4] ss:$16 sps:$4 sm:$0xff]   ;;  %1272 = vmatpush1.bf16.msra.mxu0 %v4879_v2  ;;  %v4885_v6 = vld [vmem:[%s7493_s2 + $0xc0] ss:$16 sps:$4 sm:$0xff]  }
   0x4   :  { %1313 = vmatpush1.bf16.msra.mxu1 %v4880_v3  ;;  %v4883_v5 = vld [vmem:[%s7493_s2 + $0x2c4] ss:$16 sps:$4 sm:$0xff]   ;;  %1273 = vmatprep.subr.bf16.mxu0 %v4881_v4  ;;  %v4886_v7 = vld [vmem:[%s7493_s2 + $0x2c0] ss:$16 sps:$4 sm:$0xff]  }
   0x5   :  { %1314 = vmatprep.subr.bf16.mxu1 %v4883_v5  ;;  %v4887_v8 = vld [vmem:[%s7493_s2 + $0xa4] ss:$16 sps:$4 sm:$0xff]   ;;  %v4891_v10 = vld [vmem:[%s7493_s2 + $0xa0] ss:$16 sps:$4 sm:$0xff]   ;;  %1344 = vmatprep.mubr.bf16.mxu1 %v5956_v51 }
   0x6   :  { %v4889_v9 = vld [vmem:[%s7493_s2 + $0x2a4] ss:$16 sps:$4 sm:$0xff]   ;;  %v4892_v11 = vld [vmem:[%s7493_s2 + $0x2a0] ss:$16 sps:$4 sm:$0xff]  }
   0x7   :  { %1274 = vmatpush1.bf16.msra.mxu0 %v4885_v6  ;;  %v4893_v12 = vld [vmem:[%s7493_s2 + $0x84] ss:$16 sps:$4 sm:$0xff]   ;;  %v4897_v14 = vld [vmem:[%s7493_s2 + $0x80] ss:$16 sps:$4 sm:$0xff]  }
   0x8   :  { %1315 = vmatpush1.bf16.msra.mxu1 %v4886_v7  ;;  %1275 = vmatprep.subr.bf16.mxu0 %v4887_v8  ;;  %v4895_v13 = vld [vmem:[%s7493_s2 + $0x284] ss:$16 sps:$4 sm:$0xff]   ;;  %v4898_v15 = vld [vmem:[%s7493_s2 + $0x280] ss:$16 sps:$4 sm:$0xff]   ;;  %v6016_v7 = vcombine.low %v42_v48, %v42_v48  ;;  %v5035_v48 = vld [vmem:[%s7493_s2 + $0x1ec] ss:$16 sps:$4 sm:$0xff]  }
   0x9   :  { %1316 = vmatprep.subr.bf16.mxu1 %v4889_v9  ;;  %v4899_v16 = vld [vmem:[%s7493_s2 + $0x64] ss:$16 sps:$4 sm:$0xff]   ;;  %v4903_v18 = vld [vmem:[%s7493_s2 + $0x60] ss:$16 sps:$4 sm:$0xff]  }
   0xa   :  { %v4901_v17 = vld [vmem:[%s7493_s2 + $0x264] ss:$16 sps:$4 sm:$0xff]   ;;  %v4904_v19 = vld [vmem:[%s7493_s2 + $0x260] ss:$16 sps:$4 sm:$0xff]  }
   0xb   :  { %1276 = vmatpush1.bf16.msra.mxu0 %v4891_v10  ;;  %v4905_v20 = vld [vmem:[%s7493_s2 + $0x44] ss:$16 sps:$4 sm:$0xff]   ;;  %v4909_v22 = vld [vmem:[%s7493_s2 + $0x40] ss:$16 sps:$4 sm:$0xff]  }
   0xc   :  { %1317 = vmatpush1.bf16.msra.mxu1 %v4892_v11  ;;  %1277 = vmatprep.subr.bf16.mxu0 %v4893_v12  ;;  %v4907_v21 = vld [vmem:[%s7493_s2 + $0x244] ss:$16 sps:$4 sm:$0xff]   ;;  %v4910_v23 = vld [vmem:[%s7493_s2 + $0x240] ss:$16 sps:$4 sm:$0xff]   ;;  %v4986_v11 = vld [vmem:[%s7493_s2 + $0xec] ss:$16 sps:$4 sm:$0xff]  }
   0xd   :  { %1318 = vmatprep.subr.bf16.mxu1 %v4895_v13  ;;  %v4911_v24 = vld [vmem:[%s7493_s2 + $0x24] ss:$16 sps:$4 sm:$0xff]   ;;  %v4915_v26 = vld [vmem:[%s7493_s2 + $0x20] ss:$16 sps:$4 sm:$0xff]   ;;  %v5735_v13 = vmov 0  }
   0xe   :  { %v4913_v25 = vld [vmem:[%s7493_s2 + $0x224] ss:$16 sps:$4 sm:$0xff]   ;;  %v4916_v27 = vld [vmem:[%s7493_s2 + $0x220] ss:$16 sps:$4 sm:$0xff]  }
   0xf   :  { %1278 = vmatpush1.bf16.msra.mxu0 %v4897_v14  ;;  %v4917_v28 = vld [vmem:[%s7493_s2 + $0x4] ss:$16 sps:$4 sm:$0xff]   ;;  %v4921_v30 = vld [vmem:[%s7493_s2] ss:$16 sps:$4 sm:$0xff]  }
  0x10   :  { %1319 = vmatpush1.bf16.msra.mxu1 %v4898_v15  ;;  %1279 = vmatprep.subr.bf16.mxu0 %v4899_v16  ;;  %v4919_v29 = vld [vmem:[%s7493_s2 + $0x204] ss:$16 sps:$4 sm:$0xff]   ;;  %v4922_v31 = vld [vmem:[%s7493_s2 + $0x200] ss:$16 sps:$4 sm:$0xff]   ;;  %v4984_v15 = vld [vmem:[%s7493_s2 + $0xe8] ss:$16 sps:$4 sm:$0xff]  }
  0x11   :  { %1320 = vmatprep.subr.bf16.mxu1 %v4901_v17  ;;  %v4923_v32 = vld [vmem:[%s7493_s2 + $0x1e4] ss:$16 sps:$4 sm:$0xff]   ;;  %v4927_v34 = vld [vmem:[%s7493_s2 + $0x1e0] ss:$16 sps:$4 sm:$0xff]   ;;  %v4990_v17 = vld [vmem:[%s7491_s0 + $0x18] ss:$0 sps:$4 sm:$0xff]  }
  0x12   :  { %v4925_v33 = vld [vmem:[%s7493_s2 + $0x3e4] ss:$16 sps:$4 sm:$0xff]   ;;  %v4928_v35 = vld [vmem:[%s7493_s2 + $0x3e0] ss:$16 sps:$4 sm:$0xff]  }
  0x13   :  { %1280 = vmatpush1.bf16.msra.mxu0 %v4903_v18  ;;  %v4929_v36 = vld [vmem:[%s7493_s2 + $0x1c4] ss:$16 sps:$4 sm:$0xff]   ;;  %v4933_v38 = vld [vmem:[%s7493_s2 + $0x1c0] ss:$16 sps:$4 sm:$0xff]   ;;  %v4993_v18 = vld [vmem:[%s7493_s2 + $0xcc] ss:$16 sps:$4 sm:$0xff]  }
  0x14   :  { %1321 = vmatpush1.bf16.msra.mxu1 %v4904_v19  ;;  %1281 = vmatprep.subr.bf16.mxu0 %v4905_v20  ;;  %v4931_v37 = vld [vmem:[%s7493_s2 + $0x3c4] ss:$16 sps:$4 sm:$0xff]   ;;  %v4934_v39 = vld [vmem:[%s7493_s2 + $0x3c0] ss:$16 sps:$4 sm:$0xff]   ;;  %v4991_v20 = vld [vmem:[%s7493_s2 + $0xc8] ss:$16 sps:$4 sm:$0xff]  }
  0x15   :  { %1322 = vmatprep.subr.bf16.mxu1 %v4907_v21  ;;  %v4935_v40 = vld [vmem:[%s7493_s2 + $0x1a4] ss:$16 sps:$4 sm:$0xff]   ;;  %v4939_v42 = vld [vmem:[%s7493_s2 + $0x1a0] ss:$16 sps:$4 sm:$0xff]  }
  0x16   :  { %v4937_v41 = vld [vmem:[%s7493_s2 + $0x3a4] ss:$16 sps:$4 sm:$0xff]   ;;  %v4940_v43 = vld [vmem:[%s7493_s2 + $0x3a0] ss:$16 sps:$4 sm:$0xff]  }
  0x17   :  { %1282 = vmatpush1.bf16.msra.mxu0 %v4909_v22  ;;  %v4941_v44 = vld [vmem:[%s7493_s2 + $0x184] ss:$16 sps:$4 sm:$0xff]   ;;  %v4945_v49 = vld [vmem:[%s7493_s2 + $0x180] ss:$16 sps:$4 sm:$0xff]   ;;  %v4999_v22 = vld [vmem:[%s7493_s2 + $0xac] ss:$16 sps:$4 sm:$0xff]  }
  0x18   :  { %1323 = vmatpush1.bf16.msra.mxu1 %v4910_v23  ;;  %1283 = vmatprep.subr.bf16.mxu0 %v4911_v24  ;;  %v4943_v45 = vld [vmem:[%s7493_s2 + $0x384] ss:$16 sps:$4 sm:$0xff]   ;;  %v4946_v50 = vld [vmem:[%s7493_s2 + $0x380] ss:$16 sps:$4 sm:$0xff]   ;;  %v4997_v24 = vld [vmem:[%s7493_s2 + $0xa8] ss:$16 sps:$4 sm:$0xff]  }
  0x19   :  { %1324 = vmatprep.subr.bf16.mxu1 %v4913_v25  ;;  %v41_v46 = vld [vmem:[%s7491_s0] sm:$0xff] }
  0x1a   :  { %v5945_v47 = vcombine.high %v41_v46, %v41_v46  ;;  %v4947_v52 = vld [vmem:[%s7493_s2 + $0x164] ss:$16 sps:$4 sm:$0xff]   ;;  %v4951_v54 = vld [vmem:[%s7493_s2 + $0x160] ss:$16 sps:$4 sm:$0xff]   ;;  %v6014_v6 = vcombine.low %v41_v46, %v41_v46  ;;  %v5027_v46 = vld [vmem:[%s7493_s2 + $0x8] ss:$16 sps:$4 sm:$0xff]  }
  0x1b   :  { %1284 = vmatpush1.bf16.msra.mxu0 %v4915_v26  ;;  %v4949_v53 = vld [vmem:[%s7493_s2 + $0x364] ss:$16 sps:$4 sm:$0xff]   ;;  %v4952_v55 = vld [vmem:[%s7493_s2 + $0x360] ss:$16 sps:$4 sm:$0xff]   ;;  %v5005_v26 = vld [vmem:[%s7493_s2 + $0x8c] ss:$16 sps:$4 sm:$0xff]  }
  0x1c   :  { %1325 = vmatpush1.bf16.msra.mxu1 %v4916_v27  ;;  %1285 = vmatprep.subr.bf16.mxu0 %v4917_v28  ;;  %v4953_v56 = vld [vmem:[%s7493_s2 + $0x144] ss:$16 sps:$4 sm:$0xff]   ;;  %v4957_v58 = vld [vmem:[%s7493_s2 + $0x140] ss:$16 sps:$4 sm:$0xff]   ;;  %v5003_v28 = vld [vmem:[%s7493_s2 + $0x88] ss:$16 sps:$4 sm:$0xff]  }
  0x1d   :  { %1326 = vmatprep.subr.bf16.mxu1 %v4919_v29  ;;  %1303 = vmatprep.mubr.bf16.mxu0 %v5945_v47  ;;  %v4955_v57 = vld [vmem:[%s7493_s2 + $0x344] ss:$16 sps:$4 sm:$0xff]   ;;  %v4958_v59 = vld [vmem:[%s7493_s2 + $0x340] ss:$16 sps:$4 sm:$0xff]  }
  0x1e   :  { %v4959_v60 = vld [vmem:[%s7493_s2 + $0x124] ss:$16 sps:$4 sm:$0xff]   ;;  %v4963_v62 = vld [vmem:[%s7493_s2 + $0x120] ss:$16 sps:$4 sm:$0xff]  }
  0x1f   :  { %1286 = vmatpush1.bf16.msra.mxu0 %v4921_v30  ;;  %v4961_v61 = vld [vmem:[%s7493_s2 + $0x324] ss:$16 sps:$4 sm:$0xff]   ;;  %v4964_v63 = vld [vmem:[%s7493_s2 + $0x320] ss:$16 sps:$4 sm:$0xff]   ;;  %v5011_v30 = vld [vmem:[%s7493_s2 + $0x6c] ss:$16 sps:$4 sm:$0xff]  }
  0x20   :  { %1327 = vmatpush1.bf16.msra.mxu1 %v4922_v31  ;;  %1287 = vmatprep.subr.bf16.mxu0 %v4923_v32  ;;  %v4965_v0 = vld [vmem:[%s7493_s2 + $0x104] ss:$16 sps:$4 sm:$0xff]   ;;  %v4969_v2 = vld [vmem:[%s7493_s2 + $0x100] ss:$16 sps:$4 sm:$0xff]  }
  0x21   :  { %1328 = vmatprep.subr.bf16.mxu1 %v4925_v33  ;;  %v4967_v1 = vld [vmem:[%s7493_s2 + $0x304] ss:$16 sps:$4 sm:$0xff]   ;;  %v4970_v3 = vld [vmem:[%s7493_s2 + $0x300] ss:$16 sps:$4 sm:$0xff]  }
  0x22   :  { %v4977_v4 = vld [vmem:[%s7493_s2 + $0x4e4] ss:$16 sps:$4 sm:$0xff]   ;;  %v4975_v8 = vld [vmem:[%s7493_s2 + $0x4e0] ss:$16 sps:$4 sm:$0xff]  }
  0x23   :  { %1288 = vmatpush2.bf16.msra.mxu0 %v4927_v34  ;;  %v4980_v5 = vld [vmem:[%s7493_s2 + $0x604] ss:$16 sps:$4 sm:$0xff]   ;;  %v4978_v9 = vld [vmem:[%s7493_s2 + $0x600] ss:$16 sps:$4 sm:$0xff]   ;;  %v5009_v34 = vld [vmem:[%s7493_s2 + $0x68] ss:$16 sps:$4 sm:$0xff]  }
  0x24   :  { %1329 = vmatpush2.bf16.msra.mxu1 %v4928_v35  ;;  %1289 = vmatprep.subr.bf16.mxu0 %v4929_v36  ;;  %v4983_v10 = vld [vmem:[%s7493_s2 + $0x4c4] ss:$16 sps:$4 sm:$0xff]   ;;  %v4981_v12 = vld [vmem:[%s7493_s2 + $0x4c0] ss:$16 sps:$4 sm:$0xff]   ;;  %v5017_v36 = vld [vmem:[%s7493_s2 + $0x4c] ss:$16 sps:$4 sm:$0xff]  }
  0x25   :  { %1330 = vmatprep.subr.bf16.mxu1 %v4931_v37  ;;  %v4989_v14 = vld [vmem:[%s7493_s2 + $0x4a4] ss:$16 sps:$4 sm:$0xff]   ;;  %v4987_v16 = vld [vmem:[%s7493_s2 + $0x4a0] ss:$16 sps:$4 sm:$0xff]  }
  0x26   :  { %v4996_v19 = vld [vmem:[%s7493_s2 + $0x484] ss:$16 sps:$4 sm:$0xff]   ;;  %v4994_v21 = vld [vmem:[%s7493_s2 + $0x480] ss:$16 sps:$4 sm:$0xff]  }
  0x27   :  { %1290 = vmatpush2.bf16.msra.mxu0 %v4933_v38  ;;  %v5002_v23 = vld [vmem:[%s7493_s2 + $0x464] ss:$16 sps:$4 sm:$0xff]   ;;  %v5000_v25 = vld [vmem:[%s7493_s2 + $0x460] ss:$16 sps:$4 sm:$0xff]   ;;  %v5015_v38 = vld [vmem:[%s7493_s2 + $0x48] ss:$16 sps:$4 sm:$0xff]  }
  0x28   :  { %1331 = vmatpush2.bf16.msra.mxu1 %v4934_v39  ;;  %1291 = vmatprep.subr.bf16.mxu0 %v4935_v40  ;;  %v5008_v27 = vld [vmem:[%s7493_s2 + $0x444] ss:$16 sps:$4 sm:$0xff]   ;;  %v5006_v29 = vld [vmem:[%s7493_s2 + $0x440] ss:$16 sps:$4 sm:$0xff]   ;;  %v5023_v40 = vld [vmem:[%s7493_s2 + $0x2c] ss:$16 sps:$4 sm:$0xff]  }
  0x29   :  { %1332 = vmatprep.subr.bf16.mxu1 %v4937_v41  ;;  %v5014_v31 = vld [vmem:[%s7493_s2 + $0x424] ss:$16 sps:$4 sm:$0xff]   ;;  %v5012_v35 = vld [vmem:[%s7493_s2 + $0x420] ss:$16 sps:$4 sm:$0xff]  }
  0x2a   :  { %v6095_v32 = vld [vmem:[%s7491_s0 + $0x10] sm:$0xff] }
  0x2b   :  { %1292 = vmatpush2.bf16.msra.mxu0 %v4939_v42  ;;  %v6099_v33 = vcombine.high %v6095_v32, %v6095_v32  ;;  %v5020_v37 = vld [vmem:[%s7493_s2 + $0x404] ss:$16 sps:$4 sm:$0xff]   ;;  %v5018_v39 = vld [vmem:[%s7493_s2 + $0x400] ss:$16 sps:$4 sm:$0xff]   ;;  %v5021_v42 = vld [vmem:[%s7493_s2 + $0x28] ss:$16 sps:$4 sm:$0xff]  }
  0x2c   :  { %1333 = vmatpush2.bf16.msra.mxu1 %v4940_v43  ;;  %1293 = vmatprep.subr.bf16.mxu0 %v4941_v44  ;;  %v5026_v41 = vld [vmem:[%s7493_s2 + $0x5e4] ss:$16 sps:$4 sm:$0xff]   ;;  %v5024_v43 = vld [vmem:[%s7493_s2 + $0x5e0] ss:$16 sps:$4 sm:$0xff]   ;;  %v5029_v44 = vld [vmem:[%s7493_s2 + $0xc] ss:$16 sps:$4 sm:$0xff]  }
  0x2d   :  { %1334 = vmatprep.subr.bf16.mxu1 %v4943_v45  ;;  %v5032_v45 = vld [vmem:[%s7493_s2 + $0x5c4] ss:$16 sps:$4 sm:$0xff]  }
  0x2f   :  { %1294 = vmatpush2.bf16.msra.mxu0 %v4945_v49  ;;  %v5038_v49 = vld [vmem:[%s7493_s2 + $0x5a4] ss:$16 sps:$4 sm:$0xff]  }
  0x30   :  { %1335 = vmatpush2.bf16.msra.mxu1 %v4946_v50  ;;  %1295 = vmatprep.subr.bf16.mxu0 %v4947_v52  ;;  %v5033_v50 = vld [vmem:[%s7493_s2 + $0x1e8] ss:$16 sps:$4 sm:$0xff]   ;;  %v5036_v52 = vld [vmem:[%s7493_s2 + $0x5a0] ss:$16 sps:$4 sm:$0xff]  }
  0x31   :  { %1336 = vmatprep.subr.bf16.mxu1 %v4949_v53  ;;  %v5041_v53 = vld [vmem:[%s7493_s2 + $0x1cc] ss:$16 sps:$4 sm:$0xff]  }
  0x33   :  { %1296 = vmatpush2.bf16.msra.mxu0 %v4951_v54  ;;  %v5044_v54 = vld [vmem:[%s7493_s2 + $0x584] ss:$16 sps:$4 sm:$0xff]  }
  0x34   :  { %1337 = vmatpush2.bf16.msra.mxu1 %v4952_v55  ;;  %1297 = vmatprep.subr.bf16.mxu0 %v4953_v56  ;;  %v5039_v55 = vld [vmem:[%s7493_s2 + $0x1c8] ss:$16 sps:$4 sm:$0xff]   ;;  %v5042_v56 = vld [vmem:[%s7493_s2 + $0x580] ss:$16 sps:$4 sm:$0xff]  }
  0x35   :  { %1338 = vmatprep.subr.bf16.mxu1 %v4955_v57  ;;  %v5047_v57 = vld [vmem:[%s7493_s2 + $0x1ac] ss:$16 sps:$4 sm:$0xff]  }
  0x37   :  { %1298 = vmatpush2.bf16.msra.mxu0 %v4957_v58  ;;  %v5050_v58 = vld [vmem:[%s7493_s2 + $0x564] ss:$16 sps:$4 sm:$0xff]  }
  0x38   :  { %1339 = vmatpush2.bf16.msra.mxu1 %v4958_v59  ;;  %1299 = vmatprep.subr.bf16.mxu0 %v4959_v60  ;;  %v5045_v59 = vld [vmem:[%s7493_s2 + $0x1a8] ss:$16 sps:$4 sm:$0xff]   ;;  %v5048_v60 = vld [vmem:[%s7493_s2 + $0x560] ss:$16 sps:$4 sm:$0xff]  }
  0x39   :  { %1340 = vmatprep.subr.bf16.mxu1 %v4961_v61  ;;  %v5053_v61 = vld [vmem:[%s7493_s2 + $0x18c] ss:$16 sps:$4 sm:$0xff]  }
  0x3b   :  { %1300 = vmatpush2.bf16.msra.mxu0 %v4963_v62  ;;  %v5056_v62 = vld [vmem:[%s7493_s2 + $0x544] ss:$16 sps:$4 sm:$0xff]  }
  0x3c   :  { %1341 = vmatpush2.bf16.msra.mxu1 %v4964_v63  ;;  %1301 = vmatprep.subr.bf16.mxu0 %v4965_v0  ;;  %v5051_v63 = vld [vmem:[%s7493_s2 + $0x188] ss:$16 sps:$4 sm:$0xff]   ;;  %v5054_v0 = vld [vmem:[%s7493_s2 + $0x540] ss:$16 sps:$4 sm:$0xff]  }
  0x3d   :  { %1342 = vmatprep.subr.bf16.mxu1 %v4967_v1  ;;  %v5059_v1 = vld [vmem:[%s7493_s2 + $0x16c] ss:$16 sps:$4 sm:$0xff]  }
  0x3f   :  { %1302 = vmatpush2.bf16.msra.mxu0 %v4969_v2  ;;  %v5062_v2 = vld [vmem:[%s7493_s2 + $0x524] ss:$16 sps:$4 sm:$0xff]  }
  0x40   :  { %1343 = vmatpush2.bf16.msra.mxu1 %v4970_v3  ;;  %1353 = vmatprep.subr.bf16.mxu0 %v4977_v4  ;;  %v5057_v3 = vld [vmem:[%s7493_s2 + $0x168] ss:$16 sps:$4 sm:$0xff]   ;;  %v5060_v4 = vld [vmem:[%s7493_s2 + $0x520] ss:$16 sps:$4 sm:$0xff]  }
  0x41   :  { %1408 = vmatprep.subr.bf16.mxu1 %v4980_v5  ;;  %v5065_v5 = vld [vmem:[%s7493_s2 + $0x14c] ss:$16 sps:$4 sm:$0xff]  }
  0x42   :  { %1304 = vmatmul.mubr.bf16.vlgmr.msra.gmra.mxu0 %v6014_v6 }
  0x43   :  { %1345 = vmatmul.mubr.bf16.vlgmr.msra.gmra.mxu1 %v6016_v7  ;;  %1354 = vmatpush1.bf16.msra.mxu0 %v4975_v8  ;;  %v5068_v8 = vld [vmem:[%s7493_s2 + $0x504] ss:$16 sps:$4 sm:$0xff]  }
  0x44   :  { %1409 = vmatpush1.bf16.msra.mxu1 %v4978_v9  ;;  %1355 = vmatprep.subr.bf16.mxu0 %v4983_v10  ;;  %v5063_v9 = vld [vmem:[%s7493_s2 + $0x148] ss:$16 sps:$4 sm:$0xff]   ;;  %v5066_v10 = vld [vmem:[%s7493_s2 + $0x500] ss:$16 sps:$4 sm:$0xff]  }
  0x45   :  { %1426 = vmatprep.mubr.bf16.mxu1 %v5735_v13  ;;  %1435 = vmatprep.subr.bf16.mxu1 %v4986_v11  ;;  %v5073_v11 = vld [vmem:[%s7493_s2 + $0x12c] ss:$16 sps:$4 sm:$0xff]  }
  0x46   :  { %1385 = vmatprep.mubr.bf16.mxu0 %v6099_v33 }
  0x47   :  { %1356 = vmatpush1.bf16.msra.mxu0 %v4981_v12  ;;  %v5076_v12 = vld [vmem:[%s7493_s2 + $0x2ec] ss:$16 sps:$4 sm:$0xff]  }
  0x48   :  { %1357 = vmatprep.subr.bf16.mxu0 %v4989_v14  ;;  %v6224_v14 = vcombine.low %v6095_v32, %v6095_v32  ;;  %v5106_v32 = vld [vmem:[%s7493_s2 + $0x24c] ss:$16 sps:$4 sm:$0xff]  }
  0x4b   :  { %4490 = vmatmul.mubr.msk.bf16.vlgmr.msra.gmra.mxu1 %vm1267_vm0, %v4990_v17  ;;  %1358 = vmatpush1.bf16.msra.mxu0 %v4987_v16  ;;  %v5074_v16 = vld [vmem:[%s7493_s2 + $0x2e8] ss:$16 sps:$4 sm:$0xff]   ;;  %v5079_v17 = vld [vmem:[%s7493_s2 + $0x10c] ss:$16 sps:$4 sm:$0xff]  }
  0x4c   :  { %1436 = vmatpush1.bf16.msra.mxu1 %v4984_v15  ;;  %1359 = vmatprep.subr.bf16.mxu0 %v4996_v19  ;;  %v5071_v15 = vld [vmem:[%s7493_s2 + $0x128] ss:$16 sps:$4 sm:$0xff]  }
  0x4d   :  { %1437 = vmatprep.subr.bf16.mxu1 %v4993_v18  ;;  %1467 = vmatprep.mubr.bf16.mxu1 %v5945_v47  ;;  %v5030_v47 = vld [vmem:[%s7493_s2 + $0x5c0] ss:$16 sps:$4 sm:$0xff]   ;;  %v5082_v18 = vld [vmem:[%s7493_s2 + $0x2cc] ss:$16 sps:$4 sm:$0xff]   ;;  %v5077_v19 = vld [vmem:[%s7493_s2 + $0x108] ss:$16 sps:$4 sm:$0xff]  }
  0x4f   :  { %1360 = vmatpush1.bf16.msra.mxu0 %v4994_v21  ;;  %v5085_v21 = vld [vmem:[%s7493_s2 + $0x4ec] ss:$16 sps:$4 sm:$0xff]  }
  0x50   :  { %1438 = vmatpush1.bf16.msra.mxu1 %v4991_v20  ;;  %1361 = vmatprep.subr.bf16.mxu0 %v5002_v23  ;;  %v5080_v20 = vld [vmem:[%s7493_s2 + $0x2c8] ss:$16 sps:$4 sm:$0xff]  }
  0x51   :  { %1439 = vmatprep.subr.bf16.mxu1 %v4999_v22  ;;  %v5088_v22 = vld [vmem:[%s7493_s2 + $0x2ac] ss:$16 sps:$4 sm:$0xff]   ;;  %v5083_v23 = vld [vmem:[%s7493_s2 + $0x4e8] ss:$16 sps:$4 sm:$0xff]  }
  0x53   :  { %1362 = vmatpush1.bf16.msra.mxu0 %v5000_v25  ;;  %v5091_v25 = vld [vmem:[%s7493_s2 + $0x4cc] ss:$16 sps:$4 sm:$0xff]  }
  0x54   :  { %1440 = vmatpush1.bf16.msra.mxu1 %v4997_v24  ;;  %1363 = vmatprep.subr.bf16.mxu0 %v5008_v27  ;;  %v5086_v24 = vld [vmem:[%s7493_s2 + $0x2a8] ss:$16 sps:$4 sm:$0xff]  }
  0x55   :  { %1441 = vmatprep.subr.bf16.mxu1 %v5005_v26  ;;  %v5094_v26 = vld [vmem:[%s7493_s2 + $0x28c] ss:$16 sps:$4 sm:$0xff]   ;;  %v5089_v27 = vld [vmem:[%s7493_s2 + $0x4c8] ss:$16 sps:$4 sm:$0xff]  }
  0x57   :  { %1364 = vmatpush1.bf16.msra.mxu0 %v5006_v29  ;;  %v5100_v29 = vld [vmem:[%s7493_s2 + $0x26c] ss:$16 sps:$4 sm:$0xff]  }
  0x58   :  { %1442 = vmatpush1.bf16.msra.mxu1 %v5003_v28  ;;  %1365 = vmatprep.subr.bf16.mxu0 %v5014_v31  ;;  %v5097_v28 = vld [vmem:[%s7493_s2 + $0x4ac] ss:$16 sps:$4 sm:$0xff]  }
  0x59   :  { %1443 = vmatprep.subr.bf16.mxu1 %v5011_v30  ;;  %v5095_v30 = vld [vmem:[%s7493_s2 + $0x4a8] ss:$16 sps:$4 sm:$0xff]   ;;  %v5103_v31 = vld [vmem:[%s7493_s2 + $0x48c] ss:$16 sps:$4 sm:$0xff]  }
  0x5b   :  { %1366 = vmatpush1.bf16.msra.mxu0 %v5012_v35  ;;  %v5109_v35 = vld [vmem:[%s7493_s2 + $0x46c] ss:$16 sps:$4 sm:$0xff]  }
  0x5c   :  { %1444 = vmatpush1.bf16.msra.mxu1 %v5009_v34  ;;  %1367 = vmatprep.subr.bf16.mxu0 %v5020_v37  ;;  %v5104_v34 = vld [vmem:[%s7493_s2 + $0x248] ss:$16 sps:$4 sm:$0xff]  }
  0x5d   :  { %1445 = vmatprep.subr.bf16.mxu1 %v5017_v36  ;;  %v5112_v36 = vld [vmem:[%s7493_s2 + $0x22c] ss:$16 sps:$4 sm:$0xff]   ;;  %v5107_v37 = vld [vmem:[%s7493_s2 + $0x468] ss:$16 sps:$4 sm:$0xff]  }
  0x5f   :  { %1368 = vmatpush1.bf16.msra.mxu0 %v5018_v39  ;;  %v5115_v39 = vld [vmem:[%s7493_s2 + $0x44c] ss:$16 sps:$4 sm:$0xff]  }
  0x60   :  { %1446 = vmatpush1.bf16.msra.mxu1 %v5015_v38  ;;  %1369 = vmatprep.subr.bf16.mxu0 %v5026_v41  ;;  %v5110_v38 = vld [vmem:[%s7493_s2 + $0x228] ss:$16 sps:$4 sm:$0xff]  }
  0x61   :  { %1447 = vmatprep.subr.bf16.mxu1 %v5023_v40  ;;  %v5118_v40 = vld [vmem:[%s7493_s2 + $0x20c] ss:$16 sps:$4 sm:$0xff]   ;;  %v5113_v41 = vld [vmem:[%s7493_s2 + $0x448] ss:$16 sps:$4 sm:$0xff]  }
  0x63   :  { %1370 = vmatpush2.bf16.msra.mxu0 %v5024_v43  ;;  %v5121_v43 = vld [vmem:[%s7493_s2 + $0x42c] ss:$16 sps:$4 sm:$0xff]  }
  0x64   :  { %1448 = vmatpush1.bf16.msra.mxu1 %v5021_v42  ;;  %1371 = vmatprep.subr.bf16.mxu0 %v5032_v45  ;;  %v5116_v42 = vld [vmem:[%s7493_s2 + $0x208] ss:$16 sps:$4 sm:$0xff]  }
  0x65   :  { %1449 = vmatprep.subr.bf16.mxu1 %v5029_v44  ;;  %v5124_v44 = vld [vmem:[%s7493_s2 + $0x3ec] ss:$16 sps:$4 sm:$0xff]   ;;  %v5119_v45 = vld [vmem:[%s7493_s2 + $0x428] ss:$16 sps:$4 sm:$0xff]  }
  0x67   :  { %1372 = vmatpush2.bf16.msra.mxu0 %v5030_v47  ;;  %v5127_v47 = vld [vmem:[%s7493_s2 + $0x40c] ss:$16 sps:$4 sm:$0xff]  }
  0x68   :  { %1450 = vmatpush1.bf16.msra.mxu1 %v5027_v46  ;;  %1373 = vmatprep.subr.bf16.mxu0 %v5038_v49  ;;  %v5122_v46 = vld [vmem:[%s7493_s2 + $0x3e8] ss:$16 sps:$4 sm:$0xff]  }
  0x69   :  { %1451 = vmatprep.subr.bf16.mxu1 %v5035_v48  ;;  %v5130_v48 = vld [vmem:[%s7493_s2 + $0x3cc] ss:$16 sps:$4 sm:$0xff]   ;;  %v5125_v49 = vld [vmem:[%s7493_s2 + $0x408] ss:$16 sps:$4 sm:$0xff]  }
  0x6b   :  { %1374 = vmatpush2.bf16.msra.mxu0 %v5036_v52  ;;  %v5133_v52 = vld [vmem:[%s7493_s2 + $0x5ec] ss:$16 sps:$4 sm:$0xff]  }
  0x6c   :  { %1452 = vmatpush2.bf16.msra.mxu1 %v5033_v50  ;;  %1375 = vmatprep.subr.bf16.mxu0 %v5044_v54  ;;  %v5128_v50 = vld [vmem:[%s7493_s2 + $0x3c8] ss:$16 sps:$4 sm:$0xff]  }
  0x6d   :  { %1453 = vmatprep.subr.bf16.mxu1 %v5041_v53  ;;  %v5136_v53 = vld [vmem:[%s7493_s2 + $0x3ac] ss:$16 sps:$4 sm:$0xff]   ;;  %v5131_v54 = vld [vmem:[%s7493_s2 + $0x5e8] ss:$16 sps:$4 sm:$0xff]  }
  0x6f   :  { %1376 = vmatpush2.bf16.msra.mxu0 %v5042_v56  ;;  %v5139_v56 = vld [vmem:[%s7493_s2 + $0x5cc] ss:$16 sps:$4 sm:$0xff]  }
  0x70   :  { %1454 = vmatpush2.bf16.msra.mxu1 %v5039_v55  ;;  %1377 = vmatprep.subr.bf16.mxu0 %v5050_v58  ;;  %v5134_v55 = vld [vmem:[%s7493_s2 + $0x3a8] ss:$16 sps:$4 sm:$0xff]  }
  0x71   :  { %1455 = vmatprep.subr.bf16.mxu1 %v5047_v57  ;;  %v5142_v57 = vld [vmem:[%s7493_s2 + $0x38c] ss:$16 sps:$4 sm:$0xff]   ;;  %v5137_v58 = vld [vmem:[%s7493_s2 + $0x5c8] ss:$16 sps:$4 sm:$0xff]  }
  0x73   :  { %1378 = vmatpush2.bf16.msra.mxu0 %v5048_v60  ;;  %v5145_v60 = vld [vmem:[%s7493_s2 + $0x5ac] ss:$16 sps:$4 sm:$0xff]  }
  0x74   :  { %1456 = vmatpush2.bf16.msra.mxu1 %v5045_v59  ;;  %1379 = vmatprep.subr.bf16.mxu0 %v5056_v62  ;;  %v5140_v59 = vld [vmem:[%s7493_s2 + $0x388] ss:$16 sps:$4 sm:$0xff]  }
  0x75   :  { %1457 = vmatprep.subr.bf16.mxu1 %v5053_v61  ;;  %v5148_v61 = vld [vmem:[%s7493_s2 + $0x36c] ss:$16 sps:$4 sm:$0xff]   ;;  %v5143_v62 = vld [vmem:[%s7493_s2 + $0x5a8] ss:$16 sps:$4 sm:$0xff]  }
  0x77   :  { %1380 = vmatpush2.bf16.msra.mxu0 %v5054_v0  ;;  %v5151_v0 = vld [vmem:[%s7493_s2 + $0x58c] ss:$16 sps:$4 sm:$0xff]  }
  0x78   :  { %1458 = vmatpush2.bf16.msra.mxu1 %v5051_v63  ;;  %1381 = vmatprep.subr.bf16.mxu0 %v5062_v2  ;;  %v5146_v63 = vld [vmem:[%s7493_s2 + $0x368] ss:$16 sps:$4 sm:$0xff]  }
  0x79   :  { %1459 = vmatprep.subr.bf16.mxu1 %v5059_v1  ;;  %v5154_v1 = vld [vmem:[%s7493_s2 + $0x34c] ss:$16 sps:$4 sm:$0xff]   ;;  %v5149_v2 = vld [vmem:[%s7493_s2 + $0x588] ss:$16 sps:$4 sm:$0xff]  }
  0x7b   :  { %1382 = vmatpush2.bf16.msra.mxu0 %v5060_v4  ;;  %v5157_v4 = vld [vmem:[%s7493_s2 + $0x56c] ss:$16 sps:$4 sm:$0xff]  }
  0x7c   :  { %1460 = vmatpush2.bf16.msra.mxu1 %v5057_v3  ;;  %1383 = vmatprep.subr.bf16.mxu0 %v5068_v8  ;;  %v5152_v3 = vld [vmem:[%s7493_s2 + $0x348] ss:$16 sps:$4 sm:$0xff]  }
  0x7d   :  { %1461 = vmatprep.subr.bf16.mxu1 %v5065_v5  ;;  %v5160_v5 = vld [vmem:[%s7493_s2 + $0x32c] ss:$16 sps:$4 sm:$0xff]   ;;  %v5155_v8 = vld [vmem:[%s7493_s2 + $0x568] ss:$16 sps:$4 sm:$0xff]  }
  0x7f   :  { %1384 = vmatpush2.bf16.msra.mxu0 %v5066_v10  ;;  %v5163_v10 = vld [vmem:[%s7493_s2 + $0x54c] ss:$16 sps:$4 sm:$0xff]  }
  0x80   :  { %1462 = vmatpush2.bf16.msra.mxu1 %v5063_v9  ;;  %1476 = vmatprep.subr.bf16.mxu0 %v5076_v12  ;;  %v5158_v9 = vld [vmem:[%s7493_s2 + $0x328] ss:$16 sps:$4 sm:$0xff]  }
  0x81   :  { %1463 = vmatprep.subr.bf16.mxu1 %v5073_v11  ;;  %v5166_v11 = vld [vmem:[%s7493_s2 + $0x30c] ss:$16 sps:$4 sm:$0xff]   ;;  %v5161_v12 = vld [vmem:[%s7493_s2 + $0x548] ss:$16 sps:$4 sm:$0xff]  }
  0x82   :  { %1386 = vmatmul.mubr.bf16.vlgmr.msra.gmra.mxu0 %v6224_v14 }
  0x83   :  { %1477 = vmatpush1.bf16.msra.mxu0 %v5074_v16  ;;  %1508 = vmatprep.mubr.bf16.mxu0 %v5956_v51  ;;  %v5092_v51 = vld [vmem:[%s7493_s2 + $0x288] ss:$16 sps:$4 sm:$0xff]   ;;  %v5169_v16 = vld [vmem:[%s7493_s2 + $0x52c] ss:$16 sps:$4 sm:$0xff]  }
  0x84   :  { %1464 = vmatpush2.bf16.msra.mxu1 %v5071_v15  ;;  %1478 = vmatprep.subr.bf16.mxu0 %v5082_v18  ;;  %v5164_v15 = vld [vmem:[%s7493_s2 + $0x308] ss:$16 sps:$4 sm:$0xff]  }
  0x85   :  { %1465 = vmatprep.subr.bf16.mxu1 %v5079_v17  ;;  %v5172_v17 = vld [vmem:[%s7493_s2 + $0x60c] ss:$16 sps:$4 sm:$0xff]   ;;  %v5167_v18 = vld [vmem:[%s7493_s2 + $0x528] ss:$16 sps:$4 sm:$0xff]  }
  0x87   :  { %1479 = vmatpush1.bf16.msra.mxu0 %v5080_v20  ;;  %v5175_v20 = vld [vmem:[%s7493_s2 + $0x50c] ss:$16 sps:$4 sm:$0xff]  }
  0x88   :  { %1466 = vmatpush2.bf16.msra.mxu1 %v5077_v19  ;;  %1480 = vmatprep.subr.bf16.mxu0 %v5088_v22  ;;  %v5170_v19 = vld [vmem:[%s7493_s2 + $0x608] ss:$16 sps:$4 sm:$0xff]  }
  0x89   :  { %1517 = vmatprep.subr.bf16.mxu1 %v5085_v21  ;;  %v5178_v21 = vld [vmem:[%s7495_s4 + $0x74] ss:$8 sps:$4 sm:$0xff]   ;;  %v5173_v22 = vld [vmem:[%s7493_s2 + $0x508] ss:$16 sps:$4 sm:$0xff]  }
  0x8b   :  { %1468 = vmatmul.mubr.bf16.vlgmr.msra.gmra.mxu1 %v6014_v6  ;;  %1481 = vmatpush1.bf16.msra.mxu0 %v5086_v24  ;;  %v5098_v6 = vld [vmem:[%s7493_s2 + $0x268] ss:$16 sps:$4 sm:$0xff]   ;;  %v5181_v24 = vld [vmem:[%s7495_s4 + $0x64] ss:$8 sps:$4 sm:$0xff]  }
  0x8c   :  { %1518 = vmatpush1.bf16.msra.mxu1 %v5083_v23  ;;  %1482 = vmatprep.subr.bf16.mxu0 %v5094_v26  ;;  %v5176_v23 = vld [vmem:[%s7495_s4 + $0x70] ss:$8 sps:$4 sm:$0xff]   ;;  %v5184_v26 = vld [vmem:[%s7495_s4 + $0x54] ss:$8 sps:$4 sm:$0xff]  }
  0x8d   :  { %1519 = vmatprep.subr.bf16.mxu1 %v5091_v25  ;;  %1549 = vmatprep.mubr.bf16.mxu1 %v6099_v33  ;;  %v5101_v33 = vld [vmem:[%s7493_s2 + $0x488] ss:$16 sps:$4 sm:$0xff]  }
  0x8e   :  { %v5670_v25 = vld [vmem:[%s7491_s0 + $0x18] ss:$0 sps:$4 sm:$0xff]  }
  0x8f   :  { %1483 = vmatpush1.bf16.msra.mxu0 %v5092_v51  ;;  %v5224_v51 = vld [vmem:[%s7495_s4 + $0x170] ss:$8 sps:$4 sm:$0xff]  }
  0x90   :  { %1520 = vmatpush1.bf16.msra.mxu1 %v5089_v27  ;;  %1484 = vmatprep.subr.bf16.mxu0 %v5100_v29  ;;  %v5182_v27 = vld [vmem:[%s7495_s4 + $0x50] ss:$8 sps:$4 sm:$0xff]   ;;  %v5229_v29 = vld [vmem:[%s7495_s4 + $0x164] ss:$8 sps:$4 sm:$0xff]  }
  0x91   :  { %1521 = vmatprep.subr.bf16.mxu1 %v5097_v28  ;;  %v5226_v28 = vld [vmem:[%s7495_s4 + $0x174] ss:$8 sps:$4 sm:$0xff]  }
  0x93   :  { %1485 = vmatpush1.bf16.msra.mxu0 %v5098_v6  ;;  %v5227_v6 = vld [vmem:[%s7495_s4 + $0x160] ss:$8 sps:$4 sm:$0xff]  }
  0x94   :  { %1522 = vmatpush1.bf16.msra.mxu1 %v5095_v30  ;;  %1486 = vmatprep.subr.bf16.mxu0 %v5106_v32  ;;  %v5185_v30 = vld [vmem:[%s7495_s4 + $0x40] ss:$8 sps:$4 sm:$0xff]   ;;  %v5232_v32 = vld [vmem:[%s7495_s4 + $0x154] ss:$8 sps:$4 sm:$0xff]  }
  0x95   :  { %1523 = vmatprep.subr.bf16.mxu1 %v5103_v31  ;;  %v5190_v31 = vld [vmem:[%s7495_s4 + $0x34] ss:$8 sps:$4 sm:$0xff]  }
  0x97   :  { %1487 = vmatpush1.bf16.msra.mxu0 %v5104_v34  ;;  %v5193_v34 = vld [vmem:[%s7495_s4 + $0x24] ss:$8 sps:$4 sm:$0xff]  }
  0x98   :  { %1524 = vmatpush1.bf16.msra.mxu1 %v5101_v33  ;;  %1488 = vmatprep.subr.bf16.mxu0 %v5112_v36  ;;  %v5188_v33 = vld [vmem:[%s7495_s4 + $0x30] ss:$8 sps:$4 sm:$0xff]   ;;  %v5235_v36 = vld [vmem:[%s7495_s4 + $0x144] ss:$8 sps:$4 sm:$0xff]  }
  0x99   :  { %1525 = vmatprep.subr.bf16.mxu1 %v5109_v35  ;;  %v5230_v35 = vld [vmem:[%s7495_s4 + $0x150] ss:$8 sps:$4 sm:$0xff]  }
  0x9b   :  { %1489 = vmatpush1.bf16.msra.mxu0 %v5110_v38  ;;  %v5233_v38 = vld [vmem:[%s7495_s4 + $0x140] ss:$8 sps:$4 sm:$0xff]  }
  0x9c   :  { %1526 = vmatpush1.bf16.msra.mxu1 %v5107_v37  ;;  %1490 = vmatprep.subr.bf16.mxu0 %v5118_v40  ;;  %v5191_v37 = vld [vmem:[%s7495_s4 + $0x20] ss:$8 sps:$4 sm:$0xff]   ;;  %v5238_v40 = vld [vmem:[%s7495_s4 + $0x134] ss:$8 sps:$4 sm:$0xff]  }
  0x9d   :  { %1527 = vmatprep.subr.bf16.mxu1 %v5115_v39  ;;  %v5196_v39 = vld [vmem:[%s7495_s4 + $0x14] ss:$8 sps:$4 sm:$0xff]  }
  0x9f   :  { %1491 = vmatpush1.bf16.msra.mxu0 %v5116_v42  ;;  %v5236_v42 = vld [vmem:[%s7495_s4 + $0x130] ss:$8 sps:$4 sm:$0xff]  }
  0xa0   :  { %1528 = vmatpush1.bf16.msra.mxu1 %v5113_v41  ;;  %1492 = vmatprep.subr.bf16.mxu0 %v5124_v44  ;;  %v5194_v41 = vld [vmem:[%s7495_s4 + $0x10] ss:$8 sps:$4 sm:$0xff]   ;;  %v5241_v44 = vld [vmem:[%s7495_s4 + $0x124] ss:$8 sps:$4 sm:$0xff]  }
  0xa1   :  { %1529 = vmatprep.subr.bf16.mxu1 %v5121_v43  ;;  %v5199_v43 = vld [vmem:[%s7495_s4 + $0x4] ss:$8 sps:$4 sm:$0xff]  }
  0xa3   :  { %1493 = vmatpush2.bf16.msra.mxu0 %v5122_v46  ;;  %v5239_v46 = vld [vmem:[%s7495_s4 + $0x120] ss:$8 sps:$4 sm:$0xff]  }
  0xa4   :  { %1530 = vmatpush1.bf16.msra.mxu1 %v5119_v45  ;;  %1494 = vmatprep.subr.bf16.mxu0 %v5130_v48  ;;  %v5197_v45 = vld [vmem:[%s7495_s4] ss:$8 sps:$4 sm:$0xff]   ;;  %v5244_v48 = vld [vmem:[%s7495_s4 + $0x114] ss:$8 sps:$4 sm:$0xff]  }
  0xa5   :  { %1531 = vmatprep.subr.bf16.mxu1 %v5127_v47  ;;  %v5202_v47 = vld [vmem:[%s7495_s4 + $0xf4] ss:$8 sps:$4 sm:$0xff]  }
  0xa7   :  { %1495 = vmatpush2.bf16.msra.mxu0 %v5128_v50  ;;  %v5242_v50 = vld [vmem:[%s7495_s4 + $0x110] ss:$8 sps:$4 sm:$0xff]  }
  0xa8   :  { %1532 = vmatpush1.bf16.msra.mxu1 %v5125_v49  ;;  %1496 = vmatprep.subr.bf16.mxu0 %v5136_v53  ;;  %v5200_v49 = vld [vmem:[%s7495_s4 + $0xf0] ss:$8 sps:$4 sm:$0xff]   ;;  %v5247_v53 = vld [vmem:[%s7495_s4 + $0x104] ss:$8 sps:$4 sm:$0xff]  }
  0xa9   :  { %1533 = vmatprep.subr.bf16.mxu1 %v5133_v52  ;;  %v5205_v52 = vld [vmem:[%s7495_s4 + $0xe4] ss:$8 sps:$4 sm:$0xff]  }
  0xab   :  { %1497 = vmatpush2.bf16.msra.mxu0 %v5134_v55  ;;  %v5245_v55 = vld [vmem:[%s7495_s4 + $0x100] ss:$8 sps:$4 sm:$0xff]  }
  0xac   :  { %1534 = vmatpush2.bf16.msra.mxu1 %v5131_v54  ;;  %1498 = vmatprep.subr.bf16.mxu0 %v5142_v57  ;;  %v5203_v54 = vld [vmem:[%s7495_s4 + $0xe0] ss:$8 sps:$4 sm:$0xff]   ;;  %v5250_v57 = vld [vmem:[%s7495_s4 + $0x1f4] ss:$8 sps:$4 sm:$0xff]  }
  0xad   :  { %1535 = vmatprep.subr.bf16.mxu1 %v5139_v56  ;;  %v5208_v56 = vld [vmem:[%s7495_s4 + $0xd4] ss:$8 sps:$4 sm:$0xff]  }
  0xaf   :  { %1499 = vmatpush2.bf16.msra.mxu0 %v5140_v59  ;;  %v5248_v59 = vld [vmem:[%s7495_s4 + $0x1f0] ss:$8 sps:$4 sm:$0xff]  }
  0xb0   :  { %1536 = vmatpush2.bf16.msra.mxu1 %v5137_v58  ;;  %1500 = vmatprep.subr.bf16.mxu0 %v5148_v61  ;;  %v5206_v58 = vld [vmem:[%s7495_s4 + $0xd0] ss:$8 sps:$4 sm:$0xff]   ;;  %v5253_v61 = vld [vmem:[%s7495_s4 + $0x1e4] ss:$8 sps:$4 sm:$0xff]  }
  0xb1   :  { %1537 = vmatprep.subr.bf16.mxu1 %v5145_v60  ;;  %v5211_v60 = vld [vmem:[%s7495_s4 + $0xc4] ss:$8 sps:$4 sm:$0xff]  }
  0xb3   :  { %1501 = vmatpush2.bf16.msra.mxu0 %v5146_v63  ;;  %v5251_v63 = vld [vmem:[%s7495_s4 + $0x1e0] ss:$8 sps:$4 sm:$0xff]  }
  0xb4   :  { %1538 = vmatpush2.bf16.msra.mxu1 %v5143_v62  ;;  %1502 = vmatprep.subr.bf16.mxu0 %v5154_v1  ;;  %v5209_v62 = vld [vmem:[%s7495_s4 + $0xc0] ss:$8 sps:$4 sm:$0xff]   ;;  %v5256_v1 = vld [vmem:[%s7495_s4 + $0x1d4] ss:$8 sps:$4 sm:$0xff]  }
  0xb5   :  { %1539 = vmatprep.subr.bf16.mxu1 %v5151_v0  ;;  %v5214_v0 = vld [vmem:[%s7495_s4 + $0xb4] ss:$8 sps:$4 sm:$0xff]  }
  0xb7   :  { %1503 = vmatpush2.bf16.msra.mxu0 %v5152_v3  ;;  %v5254_v3 = vld [vmem:[%s7495_s4 + $0x1d0] ss:$8 sps:$4 sm:$0xff]  }
  0xb8   :  { %1540 = vmatpush2.bf16.msra.mxu1 %v5149_v2  ;;  %1504 = vmatprep.subr.bf16.mxu0 %v5160_v5  ;;  %v5212_v2 = vld [vmem:[%s7495_s4 + $0xb0] ss:$8 sps:$4 sm:$0xff]   ;;  %v5259_v5 = vld [vmem:[%s7495_s4 + $0x1c4] ss:$8 sps:$4 sm:$0xff]  }
  0xb9   :  { %1541 = vmatprep.subr.bf16.mxu1 %v5157_v4  ;;  %v5217_v4 = vld [vmem:[%s7495_s4 + $0xa4] ss:$8 sps:$4 sm:$0xff]  }
  0xbb   :  { %1505 = vmatpush2.bf16.msra.mxu0 %v5158_v9  ;;  %v5257_v9 = vld [vmem:[%s7495_s4 + $0x1c0] ss:$8 sps:$4 sm:$0xff]  }
  0xbc   :  { %1542 = vmatpush2.bf16.msra.mxu1 %v5155_v8  ;;  %1506 = vmatprep.subr.bf16.mxu0 %v5166_v11  ;;  %v5215_v8 = vld [vmem:[%s7495_s4 + $0xa0] ss:$8 sps:$4 sm:$0xff]   ;;  %v5218_v11 = vld [vmem:[%s7495_s4 + $0x90] ss:$8 sps:$4 sm:$0xff]  }
  0xbd   :  { %1543 = vmatprep.subr.bf16.mxu1 %v5163_v10  ;;  %v5220_v10 = vld [vmem:[%s7495_s4 + $0x94] ss:$8 sps:$4 sm:$0xff]  }
  0xbf   :  { %1507 = vmatpush2.bf16.msra.mxu0 %v5164_v15  ;;  %v5221_v15 = vld [vmem:[%s7495_s4 + $0x80] ss:$8 sps:$4 sm:$0xff]  }
  0xc0   :  { %1544 = vmatpush2.bf16.msra.mxu1 %v5161_v12  ;;  %1572 = vmatprep.subr.bf16.mxu0 %v5172_v17  ;;  %v5223_v12 = vld [vmem:[%s7495_s4 + $0x84] ss:$8 sps:$4 sm:$0xff]  }
  0xc1   :  { %1545 = vmatprep.subr.bf16.mxu1 %v5169_v16 }
  0xc2   :  { %1509 = vmatmul.mubr.bf16.vlgmr.msra.gmra.mxu0 %v6016_v7  ;;  %v5179_v7 = vld [vmem:[%s7495_s4 + $0x60] ss:$8 sps:$4 sm:$0xff]  }
  0xc3   :  { %1573 = vmatpush1.bf16.msra.mxu0 %v5170_v19  ;;  %1590 = vmatprep.mubr.bf16.mxu0 %v5735_v13 }
  0xc4   :  { %1546 = vmatpush2.bf16.msra.mxu1 %v5167_v18  ;;  %2003 = vmatprep.subr.bf16.mxu0 %v5178_v21  ;;  %v5260_v21 = vld [vmem:[%s7495_s4 + $0x1b0] ss:$8 sps:$4 sm:$0xff]  }
  0xc5   :  { %1547 = vmatprep.subr.bf16.mxu1 %v5175_v20  ;;  %v5262_v20 = vld [vmem:[%s7495_s4 + $0x1b4] ss:$8 sps:$4 sm:$0xff]  }
  0xc8   :  { %1548 = vmatpush2.bf16.msra.mxu1 %v5173_v22 }
  0xc9   :  { %2044 = vmatprep.subr.bf16.mxu1 %v5226_v28  ;;  %v5266_v28 = vld [vmem:[%s7495_s4 + $0x190] ss:$8 sps:$4 sm:$0xff]  }
  0xca   :  { %4491 = vmatmul.mubr.msk.bf16.vlgmr.msra.gmra.mxu0 %vm1267_vm0, %v5670_v25  ;;  %v5265_v25 = vld [vmem:[%s7495_s4 + $0x1a4] ss:$8 sps:$4 sm:$0xff]  }
  0xcb   :  { %1550 = vmatmul.mubr.bf16.vlgmr.msra.gmra.mxu1 %v6224_v14  ;;  %2004 = vmatpush1.bf16.msra.mxu0 %v5176_v23  ;;  %v5187_v14 = vld [vmem:[%s7495_s4 + $0x44] ss:$8 sps:$4 sm:$0xff]  }
  0xcc   :  { %2005 = vmatprep.subr.bf16.mxu0 %v5181_v24  ;;  %2045 = vmatpush1.bf16.msra.mxu1 %v5224_v51  ;;  %v5268_v51 = vld [vmem:[%s7495_s4 + $0x194] ss:$8 sps:$4 sm:$0xff]  }
  0xcd   :  { %2046 = vmatprep.subr.bf16.mxu1 %v5229_v29 }
  0xcf   :  { %2006 = vmatpush1.bf16.msra.mxu0 %v5179_v7 }
  0xd0   :  { %2007 = vmatprep.subr.bf16.mxu0 %v5184_v26  ;;  %2047 = vmatpush1.bf16.msra.mxu1 %v5227_v6  ;;  %v5263_v26 = vld [vmem:[%s7495_s4 + $0x1a0] ss:$8 sps:$4 sm:$0xff]  }
  0xd1   :  { %2048 = vmatprep.subr.bf16.mxu1 %v5232_v32 }
  0xd3   :  { %2008 = vmatpush1.bf16.msra.mxu0 %v5182_v27 }
  0xd4   :  { %2009 = vmatprep.subr.bf16.mxu0 %v5187_v14  ;;  %2049 = vmatpush1.bf16.msra.mxu1 %v5230_v35 }
  0xd5   :  { %2050 = vmatprep.subr.bf16.mxu1 %v5235_v36 }
  0xd7   :  { %2010 = vmatpush1.bf16.msra.mxu0 %v5185_v30 }
  0xd8   :  { %2011 = vmatprep.subr.bf16.mxu0 %v5190_v31  ;;  %2051 = vmatpush1.bf16.msra.mxu1 %v5233_v38 }
  0xd9   :  { %2052 = vmatprep.subr.bf16.mxu1 %v5238_v40 }
  0xdb   :  { %2012 = vmatpush1.bf16.msra.mxu0 %v5188_v33 }
  0xdc   :  { %2013 = vmatprep.subr.bf16.mxu0 %v5193_v34  ;;  %2053 = vmatpush1.bf16.msra.mxu1 %v5236_v42 }
  0xdd   :  { %2054 = vmatprep.subr.bf16.mxu1 %v5241_v44 }
  0xdf   :  { %2014 = vmatpush1.bf16.msra.mxu0 %v5191_v37 }
  0xe0   :  { %2015 = vmatprep.subr.bf16.mxu0 %v5196_v39  ;;  %2055 = vmatpush1.bf16.msra.mxu1 %v5239_v46 }
  0xe1   :  { %2056 = vmatprep.subr.bf16.mxu1 %v5244_v48 }
  0xe3   :  { %2016 = vmatpush1.bf16.msra.mxu0 %v5194_v41 }
  0xe4   :  { %2017 = vmatprep.subr.bf16.mxu0 %v5199_v43  ;;  %2057 = vmatpush1.bf16.msra.mxu1 %v5242_v50 }
  0xe5   :  { %2058 = vmatprep.subr.bf16.mxu1 %v5247_v53 }
  0xe7   :  { %2018 = vmatpush1.bf16.msra.mxu0 %v5197_v45 }
  0xe8   :  { %2019 = vmatprep.subr.bf16.mxu0 %v5202_v47  ;;  %2059 = vmatpush1.bf16.msra.mxu1 %v5245_v55 }
  0xe9   :  { %2060 = vmatprep.subr.bf16.mxu1 %v5250_v57 }
  0xeb   :  { %2020 = vmatpush2.bf16.msra.mxu0 %v5200_v49 }
  0xec   :  { %2021 = vmatprep.subr.bf16.mxu0 %v5205_v52  ;;  %2061 = vmatpush2.bf16.msra.mxu1 %v5248_v59 }
  0xed   :  { %2062 = vmatprep.subr.bf16.mxu1 %v5253_v61 }
  0xef   :  { %2022 = vmatpush2.bf16.msra.mxu0 %v5203_v54 }
  0xf0   :  { %2023 = vmatprep.subr.bf16.mxu0 %v5208_v56  ;;  %2063 = vmatpush2.bf16.msra.mxu1 %v5251_v63 }
  0xf1   :  { %2064 = vmatprep.subr.bf16.mxu1 %v5256_v1 }
  0xf3   :  { %2024 = vmatpush2.bf16.msra.mxu0 %v5206_v58 }
  0xf4   :  { %2025 = vmatprep.subr.bf16.mxu0 %v5211_v60  ;;  %2065 = vmatpush2.bf16.msra.mxu1 %v5254_v3 }
  0xf5   :  { %2066 = vmatprep.subr.bf16.mxu1 %v5259_v5 }
  0xf7   :  { %2026 = vmatpush2.bf16.msra.mxu0 %v5209_v62 }
  0xf8   :  { %2027 = vmatprep.subr.bf16.mxu0 %v5214_v0  ;;  %2067 = vmatpush2.bf16.msra.mxu1 %v5257_v9 }
  0xf9   :  { %2068 = vmatprep.subr.bf16.mxu1 %v5262_v20 }
  0xfb   :  { %2028 = vmatpush2.bf16.msra.mxu0 %v5212_v2 }
  0xfc   :  { %2029 = vmatprep.subr.bf16.mxu0 %v5217_v4  ;;  %2069 = vmatpush2.bf16.msra.mxu1 %v5260_v21 }
  0xfd   :  { %2070 = vmatprep.subr.bf16.mxu1 %v5265_v25 }
  0xff   :  { %2030 = vmatpush2.bf16.msra.mxu0 %v5215_v8 }
 0x100   :  { %2031 = vmatprep.subr.bf16.mxu0 %v5220_v10  ;;  %2071 = vmatpush2.bf16.msra.mxu1 %v5263_v26 }
 0x102   :  { %v1305_v16 = vpop.f32.mrf.mxu0 }
 0x103   :  { %v1346_v17 = vpop.f32.mrf.mxu1  ;;  %2032 = vmatpush2.bf16.msra.mxu0 %v5218_v11 }
 0x104   :  { %v1307_v18 = vpop.f32.mrf.mxu0  ;;  %2033 = vmatprep.subr.bf16.mxu0 %v5223_v12 }
 0x105   :  { %v1348_v19 = vpop.f32.mrf.mxu1 }
 0x106   :  { %v1309_v22 = vpop.f32.mrf.mxu0 }
 0x107   :  { %v1350_v23 = vpop.f32.mrf.mxu1  ;;  %2034 = vmatpush2.bf16.msra.mxu0 %v5221_v15 }
 0x108   :  { %v1310_v24 = vpop.f32.mrf.mxu0 }
 0x109   :  { %v1351_v7 = vpop.f32.mrf.mxu1 }
 0x10b   :  { %v1428_v27 = vpop.f32.mrf.mxu1 }
 0x10d   :  { %v1430_v14 = vpop.f32.mrf.mxu1 }
 0x10e   :  { %19 = vsyncpa [#allocation5], 0  ;;  %2072 = vmatprep.subr.bf16.mxu1 %v5268_v51  ;;  %v5271_v6 = vld [vmem:[%s7495_s4 + $0x184] ss:$8 sps:$4 sm:$0xff]   ;;  %v5269_v31 = vld [vmem:[%s7495_s4 + $0x180] ss:$8 sps:$4 sm:$0xff]   ;;  %v243_v32 = vlaneseq }
 0x10f   :  { %v1432_v29 = vpop.f32.mrf.mxu1  ;;  %2073 = vmatpush2.bf16.msra.mxu1 %v5266_v28  ;;  %v241_v35 = vld [vmem:[%s7494_s3] sm:$0xf]  ;;  %v5275_v51 = vld [vmem:[%s7497_s6 + $0xe8] ss:$16 sps:$4 sm:$0xff]   ;;  %v5277_v28 = vld [vmem:[%s7497_s6 + $0xec] ss:$16 sps:$4 sm:$0xff]  }
 0x110   :  { %2074 = vmatprep.subr.bf16.mxu1 %v5271_v6  ;;  %v6633_v33 = vshrl.u32 %v243_v32, 7  ;;  %v5280_v29 = vld [vmem:[%s7497_s6 + $0xc4] ss:$16 sps:$4 sm:$0xff]   ;;  %v5278_v6 = vld [vmem:[%s7497_s6 + $0xc0] ss:$16 sps:$4 sm:$0xff]  }
 0x111   :  { %v1433_v30 = vpop.f32.mrf.mxu1  ;;  %v5289_v32 = vld [vmem:[%s7497_s6 + $0xac] ss:$16 sps:$4 sm:$0xff]  }
 0x112   :  { %v6636_v34 = vsub.s32 0, %v6633_v33  ;;  %v6642_v36 = vsub.s32 1, %v6633_v33  ;;  %v6648_v60 = vsub.s32 2, %v6633_v33  ;;  %v6651_v61 = vsub.s32 3, %v6633_v33  ;;  %v5283_v30 = vld [vmem:[%s7497_s6 + $0xcc] ss:$16 sps:$4 sm:$0xff]  }
 0x113   :  { %2075 = vmatpush2.bf16.msra.mxu1 %v5269_v31  ;;  %v5281_v31 = vld [vmem:[%s7497_s6 + $0xc8] ss:$16 sps:$4 sm:$0xff]  }
 0x114   :  { %v246_v37 = vrot.slane %v241_v35, %v6636_v34  ;;  %v250_v38 = vrot.slane %v241_v35, %v6642_v36  ;;  %v254_v63 = vrot.slane %v241_v35, %v6648_v60  ;;  %v258_v1 = vrot.slane %v241_v35, %v6651_v61  ;;  %2348 = vmatprep.subr.bf16.mxu1 %v5277_v28  ;;  %v5284_v35 = vld [vmem:[%s7497_s6 + $0xa0] ss:$16 sps:$4 sm:$0xff]  }
 0x115   :  { %v5329_v28 = vld [vmem:[%s7499_s8 + $0x4d0] ss:$28 sps:$4 sm:$0xff]  }
 0x116   :  { %v1306_v39 = vadd.f32 %v1305_v16, %v246_v37  ;;  %v1308_v40 = vadd.f32 %v1307_v18, %v250_v38  ;;  %v5287_v37 = vld [vmem:[%s7497_s6 + $0xa8] ss:$16 sps:$4 sm:$0xff]   ;;  %v5292_v38 = vld [vmem:[%s7497_s6 + $0x84] ss:$16 sps:$4 sm:$0xff]  }
 0x118   :  { %v1347_v41 = vadd.f32 %v1346_v17, %v1306_v39  ;;  %v1349_v43 = vadd.f32 %v1348_v19, %v1308_v40  ;;  %v5295_v39 = vld [vmem:[%s7497_s6 + $0x8c] ss:$16 sps:$4 sm:$0xff]   ;;  %v5290_v40 = vld [vmem:[%s7497_s6 + $0x80] ss:$16 sps:$4 sm:$0xff]  }
 0x142   :  { %v1387_v42 = vpop.f32.mrf.mxu0 }
 0x143   :  { %v1388_v44 = vadd.f32 %v1387_v42, %v1347_v41  ;;  %v5293_v41 = vld [vmem:[%s7497_s6 + $0x88] ss:$16 sps:$4 sm:$0xff]   ;;  %v5298_v42 = vld [vmem:[%s7497_s6 + $0x64] ss:$16 sps:$4 sm:$0xff]  }
 0x144   :  { %v1389_v45 = vpop.f32.mrf.mxu0 }
 0x145   :  { %v1429_v46 = vadd.f32 %v1428_v27, %v1388_v44  ;;  %v1390_v47 = vadd.f32 %v1389_v45, %v1349_v43  ;;  %v5272_v27 = vld [vmem:[%s7497_s6 + $0xe0] ss:$16 sps:$4 sm:$0xff]   ;;  %v5299_v44 = vld [vmem:[%s7497_s6 + $0x68] ss:$16 sps:$4 sm:$0xff]   ;;  %v5301_v45 = vld [vmem:[%s7497_s6 + $0x6c] ss:$16 sps:$4 sm:$0xff]  }
 0x146   :  { %v1391_v48 = vpop.f32.mrf.mxu0  ;;  %v5296_v43 = vld [vmem:[%s7497_s6 + $0x60] ss:$16 sps:$4 sm:$0xff]  }
 0x147   :  { %v1431_v49 = vadd.f32 %v1430_v14, %v1390_v47  ;;  %v1599_v50 = vmax.f32 %v1429_v46, 0.0  ;;  %v5274_v14 = vld [vmem:[%s7497_s6 + $0xe4] ss:$16 sps:$4 sm:$0xff]   ;;  %v5307_v47 = vld [vmem:[%s7497_s6 + $0x4c] ss:$16 sps:$4 sm:$0xff]  }
 0x148   :  { %v1392_v52 = vpop.f32.mrf.mxu0  ;;  %2307 = vmatprep.subr.bf16.mxu0 %v5274_v14  ;;  %v5304_v46 = vld [vmem:[%s7497_s6 + $0x44] ss:$16 sps:$4 sm:$0xff]   ;;  %v5302_v48 = vld [vmem:[%s7497_s6 + $0x40] ss:$16 sps:$4 sm:$0xff]  }
 0x149   :  { %v1600_v53 = vmax.f32 %v1431_v49, 0.0  ;;  %v1603_v56 = vpack.c.bf16 %v1599_v50, %v1599_v50  ;;  %v5305_v49 = vld [vmem:[%s7497_s6 + $0x48] ss:$16 sps:$4 sm:$0xff]   ;;  %v5310_v50 = vld [vmem:[%s7497_s6 + $0x24] ss:$16 sps:$4 sm:$0xff]  }
 0x14a   :  { %v5313_v52 = vld [vmem:[%s7497_s6 + $0x2c] ss:$16 sps:$4 sm:$0xff]   ;;  %v5331_v14 = vld [vmem:[%s7499_s8 + $0x4d4] ss:$28 sps:$4 sm:$0xff]  }
 0x14b   :  { %v1469_v54 = vpop.f32.mrf.mxu1  ;;  %v1604_v55 = vpack.c.bf16 %v1600_v53, %v1600_v53  ;;  %v5308_v53 = vld [vmem:[%s7497_s6 + $0x20] ss:$16 sps:$4 sm:$0xff]  }
 0x14c   :  { %v1470_v3 = vadd.f32 %v1469_v54, %v254_v63  ;;  %v5311_v54 = vld [vmem:[%s7497_s6 + $0x28] ss:$16 sps:$4 sm:$0xff]  }
 0x14d   :  { %v1471_v57 = vpop.f32.mrf.mxu1  ;;  %2035 = vmatprep.mubr.bf16.mxu0 %v1604_v55  ;;  %v5316_v55 = vld [vmem:[%s7497_s6 + $0x4] ss:$16 sps:$4 sm:$0xff]  }
 0x14e   :  { %2036 = vmatmul.mubr.bf16.vlgmr.msra.gmra.mxu0 %v1603_v56  ;;  %v1472_v5 = vadd.f32 %v1471_v57, %v258_v1  ;;  %v5319_v56 = vld [vmem:[%s7497_s6 + $0xc] ss:$16 sps:$4 sm:$0xff]   ;;  %v5314_v57 = vld [vmem:[%s7497_s6] ss:$16 sps:$4 sm:$0xff]  }
 0x14f   :  { %v1473_v58 = vpop.f32.mrf.mxu1  ;;  %2339 = vmatprep.mubr.bf16.mxu0 %v5735_v13  ;;  %2308 = vmatpush1.bf16.msra.mxu0 %v5272_v27  ;;  %v5328_v27 = vld [vmem:[%s7499_s8 + $0x154] ss:$28 sps:$4 sm:$0xff]  }
 0x150   :  { %2309 = vmatprep.subr.bf16.mxu0 %v5280_v29  ;;  %v5317_v58 = vld [vmem:[%s7497_s6 + $0x8] ss:$16 sps:$4 sm:$0xff]  }
 0x151   :  { %v1474_v59 = vpop.f32.mrf.mxu1  ;;  %v5334_v29 = vld [vmem:[%s7499_s8 + $0x11c] ss:$28 sps:$4 sm:$0xff]  }
 0x152   :  { %v5322_v59 = vld [vmem:[%s7499_s8 + $0x18c] ss:$28 sps:$4 sm:$0xff]  }
 0x153   :  { %2310 = vmatpush1.bf16.msra.mxu0 %v5278_v6  ;;  %v5332_v6 = vld [vmem:[%s7499_s8 + $0x118] ss:$28 sps:$4 sm:$0xff]  }
 0x182   :  { %v1510_v62 = vpop.f32.mrf.mxu0 }
 0x183   :  { %v1511_v8 = vadd.f32 %v1510_v62, %v1470_v3  ;;  %v5325_v62 = vld [vmem:[%s7499_s8 + $0x50c] ss:$28 sps:$4 sm:$0xff]   ;;  %v1671_v3 = vld [vmem:[%s7496_s5] sm:$0x3] }
 0x184   :  { %v1512_v0 = vpop.f32.mrf.mxu0 }
 0x185   :  { %v1513_v11 = vadd.f32 %v1512_v0, %v1472_v5  ;;  %v1680_v5 = vrot.slane %v1671_v3, %v6642_v36 }
 0x186   :  { %v1514_v2 = vpop.f32.mrf.mxu0 }
 0x188   :  { %v1515_v4 = vpop.f32.mrf.mxu0 }
 0x189   :  { %v1676_v4 = vrot.slane %v1671_v3, %v6636_v34  ;;  %v5380_v3 = vld [vmem:[%s7499_s8 + $0x2d8] ss:$28 sps:$4 sm:$0xff]  }
 0x18a   :  { %v1592_v10 = vpop.f32.mrf.mxu0 }
 0x18b   :  { %v1551_v9 = vpop.f32.mrf.mxu1 }
 0x18c   :  { %v1552_v12 = vadd.f32 %v1551_v9, %v1511_v8  ;;  %v1594_v16 = vpop.f32.mrf.mxu0 }
 0x18d   :  { %v1553_v15 = vpop.f32.mrf.mxu1 }
 0x18e   :  { %v1593_v17 = vadd.f32 %v1592_v10, %v1552_v12  ;;  %v1554_v18 = vadd.f32 %v1553_v15, %v1513_v11  ;;  %v1596_v20 = vpop.f32.mrf.mxu0 }
 0x18f   :  { %v1555_v19 = vpop.f32.mrf.mxu1  ;;  %v2088_v20 = vld [vmem:[%s7492_s1] sm:$0xf] }
 0x190   :  { %v1595_v21 = vadd.f32 %v1594_v16, %v1554_v18  ;;  %v1601_v22 = vmax.f32 %v1593_v17, 0.0  ;;  %v1597_v24 = vpop.f32.mrf.mxu0 }
 0x191   :  { %v1556_v23 = vpop.f32.mrf.mxu1 }
 0x192   :  { %v1602_v7 = vmax.f32 %v1595_v21, 0.0  ;;  %v1605_v26 = vpack.c.bf16 %v1601_v22, %v1601_v22  ;;  %v2089_v21 = vunpack.c.l.bf16 %v2088_v20  ;;  %v5401_v20 = vld [vmem:[%s7499_s8 + $0x5b0] ss:$28 sps:$4 sm:$0xff]  }
 0x194   :  { %v1606_v25 = vpack.c.bf16 %v1602_v7, %v1602_v7  ;;  %v5320_v7 = vld [vmem:[%s7499_s8 + $0x188] ss:$28 sps:$4 sm:$0xff]  }
 0x196   :  { %2076 = vmatprep.mubr.bf16.mxu1 %v1606_v25  ;;  %v5323_v25 = vld [vmem:[%s7499_s8 + $0x508] ss:$28 sps:$4 sm:$0xff]  }
 0x197   :  { %2077 = vmatmul.mubr.bf16.vlgmr.msra.gmra.mxu1 %v1605_v26 }
 0x198   :  { %2349 = vmatpush1.bf16.msra.mxu1 %v5275_v51  ;;  %2380 = vmatprep.mubr.bf16.mxu1 %v5735_v13  ;;  %v5286_v13 = vld [vmem:[%s7497_s6 + $0xa4] ss:$16 sps:$4 sm:$0xff]   ;;  %v5326_v51 = vld [vmem:[%s7499_s8 + $0x150] ss:$28 sps:$4 sm:$0xff]  }
 0x199   :  { %2350 = vmatprep.subr.bf16.mxu1 %v5283_v30  ;;  %2311 = vmatprep.subr.bf16.mxu0 %v5286_v13  ;;  %v5337_v30 = vld [vmem:[%s7499_s8 + $0x49c] ss:$28 sps:$4 sm:$0xff]   ;;  %v5340_v13 = vld [vmem:[%s7499_s8 + $0xe4] ss:$28 sps:$4 sm:$0xff]  }
 0x19a   :  { %2312 = vmatpush1.bf16.msra.mxu0 %v5284_v35  ;;  %v5338_v35 = vld [vmem:[%s7499_s8 + $0xe0] ss:$28 sps:$4 sm:$0xff]  }
 0x19b   :  { %2313 = vmatprep.subr.bf16.mxu0 %v5292_v38  ;;  %v5346_v38 = vld [vmem:[%s7499_s8 + $0xac] ss:$28 sps:$4 sm:$0xff]  }
 0x19c   :  { %2351 = vmatpush1.bf16.msra.mxu1 %v5281_v31  ;;  %v5335_v31 = vld [vmem:[%s7499_s8 + $0x498] ss:$28 sps:$4 sm:$0xff]  }
 0x19d   :  { %2352 = vmatprep.subr.bf16.mxu1 %v5289_v32  ;;  %v5343_v32 = vld [vmem:[%s7499_s8 + $0x464] ss:$28 sps:$4 sm:$0xff]  }
 0x19e   :  { %2314 = vmatpush1.bf16.msra.mxu0 %v5290_v40  ;;  %v5344_v40 = vld [vmem:[%s7499_s8 + $0xa8] ss:$28 sps:$4 sm:$0xff]  }
 0x19f   :  { %2315 = vmatprep.subr.bf16.mxu0 %v5298_v42  ;;  %v5352_v42 = vld [vmem:[%s7499_s8 + $0x74] ss:$28 sps:$4 sm:$0xff]  }
 0x1a0   :  { %2353 = vmatpush1.bf16.msra.mxu1 %v5287_v37  ;;  %v5341_v37 = vld [vmem:[%s7499_s8 + $0x460] ss:$28 sps:$4 sm:$0xff]  }
 0x1a1   :  { %2354 = vmatprep.subr.bf16.mxu1 %v5295_v39  ;;  %v5349_v39 = vld [vmem:[%s7499_s8 + $0x42c] ss:$28 sps:$4 sm:$0xff]  }
 0x1a2   :  { %2316 = vmatpush1.bf16.msra.mxu0 %v5296_v43  ;;  %v5355_v43 = vld [vmem:[%s7499_s8 + $0x3f4] ss:$28 sps:$4 sm:$0xff]  }
 0x1a3   :  { %2317 = vmatprep.subr.bf16.mxu0 %v5304_v46  ;;  %v5358_v46 = vld [vmem:[%s7499_s8 + $0x3c] ss:$28 sps:$4 sm:$0xff]  }
 0x1a4   :  { %2355 = vmatpush1.bf16.msra.mxu1 %v5293_v41  ;;  %v5347_v41 = vld [vmem:[%s7499_s8 + $0x428] ss:$28 sps:$4 sm:$0xff]  }
 0x1a5   :  { %2356 = vmatprep.subr.bf16.mxu1 %v5301_v45  ;;  %v5353_v45 = vld [vmem:[%s7499_s8 + $0x3f0] ss:$28 sps:$4 sm:$0xff]  }
 0x1a6   :  { %2318 = vmatpush1.bf16.msra.mxu0 %v5302_v48  ;;  %v5356_v48 = vld [vmem:[%s7499_s8 + $0x38] ss:$28 sps:$4 sm:$0xff]  }
 0x1a7   :  { %2319 = vmatprep.subr.bf16.mxu0 %v5310_v50  ;;  %v5364_v50 = vld [vmem:[%s7499_s8 + $0x4] ss:$28 sps:$4 sm:$0xff]  }
 0x1a8   :  { %2357 = vmatpush1.bf16.msra.mxu1 %v5299_v44  ;;  %v5350_v44 = vld [vmem:[%s7499_s8 + $0x70] ss:$28 sps:$4 sm:$0xff]  }
 0x1a9   :  { %2358 = vmatprep.subr.bf16.mxu1 %v5307_v47  ;;  %v5361_v47 = vld [vmem:[%s7499_s8 + $0x3bc] ss:$28 sps:$4 sm:$0xff]  }
 0x1aa   :  { %2320 = vmatpush1.bf16.msra.mxu0 %v5308_v53  ;;  %v5362_v53 = vld [vmem:[%s7499_s8] ss:$28 sps:$4 sm:$0xff]  }
 0x1ab   :  { %2321 = vmatprep.subr.bf16.mxu0 %v5316_v55  ;;  %v5370_v55 = vld [vmem:[%s7499_s8 + $0x34c] ss:$28 sps:$4 sm:$0xff]  }
 0x1ac   :  { %2359 = vmatpush1.bf16.msra.mxu1 %v5305_v49  ;;  %v5359_v49 = vld [vmem:[%s7499_s8 + $0x3b8] ss:$28 sps:$4 sm:$0xff]  }
 0x1ad   :  { %2360 = vmatprep.subr.bf16.mxu1 %v5313_v52  ;;  %v5367_v52 = vld [vmem:[%s7499_s8 + $0x384] ss:$28 sps:$4 sm:$0xff]  }
 0x1ae   :  { %2322 = vmatpush1.bf16.msra.mxu0 %v5314_v57  ;;  %v5368_v57 = vld [vmem:[%s7499_s8 + $0x348] ss:$28 sps:$4 sm:$0xff]  }
 0x1af   :  { %3842 = vmatprep.subr.bf16.mxu0 %v5322_v59  ;;  %v5376_v59 = vld [vmem:[%s7499_s8 + $0x314] ss:$28 sps:$4 sm:$0xff]  }
 0x1b0   :  { %2361 = vmatpush1.bf16.msra.mxu1 %v5311_v54  ;;  %v5365_v54 = vld [vmem:[%s7499_s8 + $0x380] ss:$28 sps:$4 sm:$0xff]  }
 0x1b1   :  { %2362 = vmatprep.subr.bf16.mxu1 %v5319_v56  ;;  %v5373_v56 = vld [vmem:[%s7499_s8 + $0x6cc] ss:$28 sps:$4 sm:$0xff]  }
 0x1b4   :  { %2363 = vmatpush1.bf16.msra.mxu1 %v5317_v58  ;;  %v5371_v58 = vld [vmem:[%s7499_s8 + $0x6c8] ss:$28 sps:$4 sm:$0xff]  }
 0x1b5   :  { %3883 = vmatprep.subr.bf16.mxu1 %v5325_v62  ;;  %v5379_v62 = vld [vmem:[%s7499_s8 + $0x694] ss:$28 sps:$4 sm:$0xff]  }
 0x20e   :  { %v2037_v63 = vpop.f32.mrf.mxu0 }
 0x20f   :  { %v2038_v8 = vadd.f32 %v2037_v63, %v1676_v4  ;;  %v5374_v63 = vld [vmem:[%s7499_s8 + $0x310] ss:$28 sps:$4 sm:$0xff]   ;;  %v5383_v4 = vld [vmem:[%s7499_s8 + $0x658] ss:$28 sps:$4 sm:$0xff]  }
 0x210   :  { %v2039_v0 = vpop.f32.mrf.mxu0 }
 0x211   :  { %v2040_v10 = vadd.f32 %v2039_v0, %v1680_v5  ;;  %v5377_v0 = vld [vmem:[%s7499_s8 + $0x690] ss:$28 sps:$4 sm:$0xff]   ;;  %v5388_v5 = vld [vmem:[%s7499_s8 + $0x2a4] ss:$28 sps:$4 sm:$0xff]  }
 0x212   :  { %v2041_v1 = vpop.f32.mrf.mxu0 }
 0x213   :  { %v5382_v1 = vld [vmem:[%s7499_s8 + $0x2dc] ss:$28 sps:$4 sm:$0xff]  }
 0x214   :  { %v2042_v2 = vpop.f32.mrf.mxu0 }
 0x215   :  { %v5385_v2 = vld [vmem:[%s7499_s8 + $0x65c] ss:$28 sps:$4 sm:$0xff]  }
 0x257   :  { %v2078_v9 = vpop.f32.mrf.mxu1 }
 0x258   :  { %v2079_v11 = vadd.f32 %v2078_v9, %v2038_v8  ;;  %v5391_v8 = vld [vmem:[%s7499_s8 + $0x624] ss:$28 sps:$4 sm:$0xff]  }
 0x259   :  { %v2080_v12 = vpop.f32.mrf.mxu1  ;;  %v5386_v9 = vld [vmem:[%s7499_s8 + $0x2a0] ss:$28 sps:$4 sm:$0xff]  }
 0x25a   :  { %4244 = vst [vmem:[#allocation4] sm:$0xff] %v2079_v11  ;;  %v2081_v15 = vadd.f32 %v2080_v12, %v2040_v10  ;;  %v5389_v10 = vld [vmem:[%s7499_s8 + $0x620] ss:$28 sps:$4 sm:$0xff]   ;;  %v5397_v12 = vld [vmem:[%s7499_s8 + $0x5ec] ss:$28 sps:$4 sm:$0xff]  }
 0x25b   :  { %v2082_v16 = vpop.f32.mrf.mxu1 }
 0x25c   :  { %v2085_v17 = vmul.f32 0.5, %v2081_v15  ;;  %4245 = vst [vmem:[#allocation6] sm:$0xff] %v2081_v15  ;;  %v5392_v15 = vld [vmem:[%s7499_s8 + $0x268] ss:$28 sps:$4 sm:$0xff]  }
 0x25d   :  { %v2083_v18 = vpop.f32.mrf.mxu1  ;;  %v5395_v16 = vld [vmem:[%s7499_s8 + $0x5e8] ss:$28 sps:$4 sm:$0xff]  }
 0x25e   :  { %v2086_v19 = vmul.f32 1.442695, %v2085_v17  ;;  %v5400_v17 = vld [vmem:[%s7499_s8 + $0x234] ss:$28 sps:$4 sm:$0xff]  }
 0x25f   :  { %v5403_v18 = vld [vmem:[%s7499_s8 + $0x5b4] ss:$28 sps:$4 sm:$0xff]  }
 0x260   :  { %5640 = vpow2.f32 %v2086_v19  ;;  %v5398_v19 = vld [vmem:[%s7499_s8 + $0x230] ss:$28 sps:$4 sm:$0xff]  }
 0x26d   :  { %v5641_v22 = vpop.eup %5640 }
 0x26e   :  { %v2090_v23 = vmul.f32 %v5641_v22, %v2089_v21  ;;  %v5406_v21 = vld [vmem:[%s7499_s8 + $0x1fc] ss:$28 sps:$4 sm:$0xff]  }
 0x26f   :  { %v5409_v22 = vld [vmem:[%s7499_s8 + $0x57c] ss:$28 sps:$4 sm:$0xff]  }
 0x270   :  { %v2091_v24 = vadd.f32 %v2090_v23, %v2079_v11  ;;  %v5394_v11 = vld [vmem:[%s7499_s8 + $0x26c] ss:$28 sps:$4 sm:$0xff]   ;;  %v5404_v23 = vld [vmem:[%s7499_s8 + $0x1f8] ss:$28 sps:$4 sm:$0xff]  }
 0x272   :  { %v2092_v26 = vpack.c.bf16 %v2091_v24, %v2091_v24  ;;  %v5407_v24 = vld [vmem:[%s7499_s8 + $0x578] ss:$28 sps:$4 sm:$0xff]  }
 0x274   :  { %2340 = vmatmul.mubr.bf16.vlgmr.msra.gmra.mxu0 %v2092_v26  ;;  %2381 = vmatmul.mubr.bf16.vlgmr.msra.gmra.mxu1 %v2092_v26  ;;  %v5410_v26 = vld [vmem:[%s7499_s8 + $0x1c0] ss:$28 sps:$4 sm:$0xff]  }
 0x275   :  { %3843 = vmatpush1.bf16.msra.mxu0 %v5320_v7  ;;  %3884 = vmatpush1.bf16.msra.mxu1 %v5323_v25  ;;  %v5412_v7 = vld [vmem:[%s7499_s8 + $0x1c4] ss:$28 sps:$4 sm:$0xff]  }
 0x276   :  { %3844 = vmatprep.subr.bf16.mxu0 %v5328_v27  ;;  %3885 = vmatprep.subr.bf16.mxu1 %v5331_v14  ;;  %v5415_v25 = vld [vmem:[%s7499_s8 + $0x544] ss:$28 sps:$4 sm:$0xff]   ;;  %v5418_v14 = vld [vmem:[%s7499_s8 + $0x194] ss:$28 sps:$4 sm:$0xff]  }
 0x277   :  { %v5413_v27 = vld [vmem:[%s7499_s8 + $0x540] ss:$28 sps:$4 sm:$0xff]  }
 0x279   :  { %3845 = vmatpush1.bf16.msra.mxu0 %v5326_v51  ;;  %3886 = vmatpush1.bf16.msra.mxu1 %v5329_v28  ;;  %v5421_v51 = vld [vmem:[%s7499_s8 + $0x514] ss:$28 sps:$4 sm:$0xff]   ;;  %v2125_v28 = vld [vmem:[%s7498_s7] sm:$0xf] }
 0x27a   :  { %3846 = vmatprep.subr.bf16.mxu0 %v5334_v29  ;;  %3887 = vmatprep.subr.bf16.mxu1 %v5337_v30  ;;  %v2130_v29 = vrot.slane %v2125_v28, %v6636_v34  ;;  %v2138_v30 = vrot.slane %v2125_v28, %v6648_v60 }
 0x27d   :  { %3847 = vmatpush1.bf16.msra.mxu0 %v5332_v6  ;;  %3888 = vmatpush1.bf16.msra.mxu1 %v5335_v31  ;;  %v2134_v6 = vrot.slane %v2125_v28, %v6642_v36  ;;  %v2142_v31 = vrot.slane %v2125_v28, %v6651_v61  ;;  %v5472_v28 = vld [vmem:[%s7499_s8 + $0x31c] ss:$28 sps:$4 sm:$0xff]  }
 0x27e   :  { %3848 = vmatprep.subr.bf16.mxu0 %v5340_v13  ;;  %3889 = vmatprep.subr.bf16.mxu1 %v5343_v32 }
 0x281   :  { %3849 = vmatpush1.bf16.msra.mxu0 %v5338_v35  ;;  %3890 = vmatpush1.bf16.msra.mxu1 %v5341_v37 }
 0x282   :  { %3850 = vmatprep.subr.bf16.mxu0 %v5346_v38  ;;  %3891 = vmatprep.subr.bf16.mxu1 %v5349_v39 }
 0x285   :  { %3851 = vmatpush1.bf16.msra.mxu0 %v5344_v40  ;;  %3892 = vmatpush1.bf16.msra.mxu1 %v5347_v41 }
 0x286   :  { %3852 = vmatprep.subr.bf16.mxu0 %v5352_v42  ;;  %3893 = vmatprep.subr.bf16.mxu1 %v5355_v43 }
 0x289   :  { %3853 = vmatpush1.bf16.msra.mxu0 %v5350_v44  ;;  %3894 = vmatpush1.bf16.msra.mxu1 %v5353_v45 }
 0x28a   :  { %3854 = vmatprep.subr.bf16.mxu0 %v5358_v46  ;;  %3895 = vmatprep.subr.bf16.mxu1 %v5361_v47 }
 0x28d   :  { %3855 = vmatpush1.bf16.msra.mxu0 %v5356_v48  ;;  %3896 = vmatpush1.bf16.msra.mxu1 %v5359_v49 }
 0x28e   :  { %3856 = vmatprep.subr.bf16.mxu0 %v5364_v50  ;;  %3897 = vmatprep.subr.bf16.mxu1 %v5367_v52 }
 0x291   :  { %3857 = vmatpush1.bf16.msra.mxu0 %v5362_v53  ;;  %3898 = vmatpush1.bf16.msra.mxu1 %v5365_v54  ;;  %v5416_v53 = vld [vmem:[%s7499_s8 + $0x190] ss:$28 sps:$4 sm:$0xff]  }
 0x292   :  { %3858 = vmatprep.subr.bf16.mxu0 %v5370_v55  ;;  %3899 = vmatprep.subr.bf16.mxu1 %v5373_v56  ;;  %v5419_v54 = vld [vmem:[%s7499_s8 + $0x510] ss:$28 sps:$4 sm:$0xff]  }
 0x295   :  { %3859 = vmatpush2.bf16.msra.mxu0 %v5368_v57  ;;  %3900 = vmatpush2.bf16.msra.mxu1 %v5371_v58  ;;  %v5424_v57 = vld [vmem:[%s7499_s8 + $0x15c] ss:$28 sps:$4 sm:$0xff]  }
 0x296   :  { %3860 = vmatprep.subr.bf16.mxu0 %v5376_v59  ;;  %3901 = vmatprep.subr.bf16.mxu1 %v5379_v62  ;;  %v5427_v58 = vld [vmem:[%s7499_s8 + $0x4dc] ss:$28 sps:$4 sm:$0xff]  }
 0x297   :  { %v5422_v59 = vld [vmem:[%s7499_s8 + $0x158] ss:$28 sps:$4 sm:$0xff]  }
 0x298   :  { %v5425_v62 = vld [vmem:[%s7499_s8 + $0x4d8] ss:$28 sps:$4 sm:$0xff]  }
 0x299   :  { %3861 = vmatpush2.bf16.msra.mxu0 %v5374_v63  ;;  %3902 = vmatpush2.bf16.msra.mxu1 %v5377_v0  ;;  %v5430_v63 = vld [vmem:[%s7499_s8 + $0x124] ss:$28 sps:$4 sm:$0xff]  }
 0x29a   :  { %3862 = vmatprep.subr.bf16.mxu0 %v5382_v1  ;;  %3903 = vmatprep.subr.bf16.mxu1 %v5385_v2  ;;  %v5433_v0 = vld [vmem:[%s7499_s8 + $0x4a4] ss:$28 sps:$4 sm:$0xff]  }
 0x29b   :  { %v5428_v1 = vld [vmem:[%s7499_s8 + $0x120] ss:$28 sps:$4 sm:$0xff]  }
 0x29c   :  { %v5431_v2 = vld [vmem:[%s7499_s8 + $0x4a0] ss:$28 sps:$4 sm:$0xff]  }
 0x29d   :  { %3863 = vmatpush2.bf16.msra.mxu0 %v5380_v3  ;;  %3904 = vmatpush2.bf16.msra.mxu1 %v5383_v4  ;;  %v5436_v3 = vld [vmem:[%s7499_s8 + $0xec] ss:$28 sps:$4 sm:$0xff]  }
 0x29e   :  { %3864 = vmatprep.subr.bf16.mxu0 %v5388_v5  ;;  %3905 = vmatprep.subr.bf16.mxu1 %v5391_v8  ;;  %v5439_v4 = vld [vmem:[%s7499_s8 + $0x46c] ss:$28 sps:$4 sm:$0xff]  }
 0x29f   :  { %v5434_v5 = vld [vmem:[%s7499_s8 + $0xe8] ss:$28 sps:$4 sm:$0xff]  }
 0x2a0   :  { %v5437_v8 = vld [vmem:[%s7499_s8 + $0x468] ss:$28 sps:$4 sm:$0xff]  }
 0x2a1   :  { %3865 = vmatpush2.bf16.msra.mxu0 %v5386_v9  ;;  %3906 = vmatpush2.bf16.msra.mxu1 %v5389_v10  ;;  %v5442_v9 = vld [vmem:[%s7499_s8 + $0xb4] ss:$28 sps:$4 sm:$0xff]  }
 0x2a2   :  { %3866 = vmatprep.subr.bf16.mxu0 %v5394_v11  ;;  %3907 = vmatprep.subr.bf16.mxu1 %v5397_v12  ;;  %v5445_v10 = vld [vmem:[%s7499_s8 + $0x434] ss:$28 sps:$4 sm:$0xff]  }
 0x2a3   :  { %v5440_v11 = vld [vmem:[%s7499_s8 + $0xb0] ss:$28 sps:$4 sm:$0xff]  }
 0x2a4   :  { %v5443_v12 = vld [vmem:[%s7499_s8 + $0x430] ss:$28 sps:$4 sm:$0xff]  }
 0x2a5   :  { %3867 = vmatpush2.bf16.msra.mxu0 %v5392_v15  ;;  %3908 = vmatpush2.bf16.msra.mxu1 %v5395_v16  ;;  %v5448_v15 = vld [vmem:[%s7499_s8 + $0x7c] ss:$28 sps:$4 sm:$0xff]  }
 0x2a6   :  { %3868 = vmatprep.subr.bf16.mxu0 %v5400_v17  ;;  %3909 = vmatprep.subr.bf16.mxu1 %v5403_v18  ;;  %v5451_v16 = vld [vmem:[%s7499_s8 + $0x3fc] ss:$28 sps:$4 sm:$0xff]  }
 0x2a7   :  { %v5446_v17 = vld [vmem:[%s7499_s8 + $0x78] ss:$28 sps:$4 sm:$0xff]  }
 0x2a8   :  { %v5449_v18 = vld [vmem:[%s7499_s8 + $0x3f8] ss:$28 sps:$4 sm:$0xff]  }
 0x2a9   :  { %3869 = vmatpush2.bf16.msra.mxu0 %v5398_v19  ;;  %3910 = vmatpush2.bf16.msra.mxu1 %v5401_v20  ;;  %v5454_v19 = vld [vmem:[%s7499_s8 + $0x44] ss:$28 sps:$4 sm:$0xff]  }
 0x2aa   :  { %3870 = vmatprep.subr.bf16.mxu0 %v5406_v21  ;;  %3911 = vmatprep.subr.bf16.mxu1 %v5409_v22  ;;  %v5457_v20 = vld [vmem:[%s7499_s8 + $0x3c4] ss:$28 sps:$4 sm:$0xff]  }
 0x2ab   :  { %v5452_v21 = vld [vmem:[%s7499_s8 + $0x40] ss:$28 sps:$4 sm:$0xff]  }
 0x2ac   :  { %v5455_v22 = vld [vmem:[%s7499_s8 + $0x3c0] ss:$28 sps:$4 sm:$0xff]  }
 0x2ad   :  { %3871 = vmatpush2.bf16.msra.mxu0 %v5404_v23  ;;  %3912 = vmatpush2.bf16.msra.mxu1 %v5407_v24  ;;  %v5460_v23 = vld [vmem:[%s7499_s8 + $0xc] ss:$28 sps:$4 sm:$0xff]  }
 0x2ae   :  { %3872 = vmatprep.subr.bf16.mxu0 %v5412_v7  ;;  %3913 = vmatprep.subr.bf16.mxu1 %v5415_v25  ;;  %v5463_v24 = vld [vmem:[%s7499_s8 + $0x38c] ss:$28 sps:$4 sm:$0xff]  }
 0x2af   :  { %v5458_v7 = vld [vmem:[%s7499_s8 + $0x8] ss:$28 sps:$4 sm:$0xff]  }
 0x2b0   :  { %v5461_v25 = vld [vmem:[%s7499_s8 + $0x388] ss:$28 sps:$4 sm:$0xff]  }
 0x2b1   :  { %3873 = vmatpush2.bf16.msra.mxu0 %v5410_v26  ;;  %3914 = vmatpush2.bf16.msra.mxu1 %v5413_v27  ;;  %v5466_v26 = vld [vmem:[%s7499_s8 + $0x354] ss:$28 sps:$4 sm:$0xff]  }
 0x2b2   :  { %3924 = vmatprep.subr.bf16.mxu0 %v5418_v14  ;;  %3965 = vmatprep.subr.bf16.mxu1 %v5421_v51  ;;  %v5469_v27 = vld [vmem:[%s7499_s8 + $0x6d4] ss:$28 sps:$4 sm:$0xff]  }
 0x2b3   :  { %v5464_v14 = vld [vmem:[%s7499_s8 + $0x350] ss:$28 sps:$4 sm:$0xff]  }
 0x2b4   :  { %v5467_v51 = vld [vmem:[%s7499_s8 + $0x6d0] ss:$28 sps:$4 sm:$0xff]  }
 0x334   :  { %v2341_v13 = vpop.f32.mrf.mxu0  ;;  %v2382_v32 = vpop.f32.mrf.mxu1 }
 0x335   :  { %v2342_v35 = vadd.f32 %v2341_v13, %v2130_v29  ;;  %v2383_v37 = vadd.f32 %v2382_v32, %v2138_v30  ;;  %v5475_v29 = vld [vmem:[%s7499_s8 + $0x69c] ss:$28 sps:$4 sm:$0xff]   ;;  %v5481_v13 = vld [vmem:[%s7499_s8 + $0x664] ss:$28 sps:$4 sm:$0xff]  }
 0x336   :  { %v2343_v38 = vpop.f32.mrf.mxu0  ;;  %v2384_v39 = vpop.f32.mrf.mxu1  ;;  %v5470_v30 = vld [vmem:[%s7499_s8 + $0x318] ss:$28 sps:$4 sm:$0xff]   ;;  %v5476_v32 = vld [vmem:[%s7499_s8 + $0x2e0] ss:$28 sps:$4 sm:$0xff]  }
 0x337   :  { %v2344_v40 = vadd.f32 %v2343_v38, %v2134_v6  ;;  %v2385_v41 = vadd.f32 %v2384_v39, %v2142_v31  ;;  %v2389_v42 = vmax.f32 %v2342_v35, 0.0  ;;  %v2391_v43 = vmax.f32 %v2383_v37, 0.0  ;;  %v5473_v6 = vld [vmem:[%s7499_s8 + $0x698] ss:$28 sps:$4 sm:$0xff]   ;;  %v5478_v31 = vld [vmem:[%s7499_s8 + $0x2e4] ss:$28 sps:$4 sm:$0xff]  }
 0x338   :  { %v2345_v44 = vpop.f32.mrf.mxu0  ;;  %v2386_v45 = vpop.f32.mrf.mxu1  ;;  %v5479_v35 = vld [vmem:[%s7499_s8 + $0x660] ss:$28 sps:$4 sm:$0xff]   ;;  %v5484_v37 = vld [vmem:[%s7499_s8 + $0x2ac] ss:$28 sps:$4 sm:$0xff]  }
 0x339   :  { %v2390_v46 = vmax.f32 %v2344_v40, 0.0  ;;  %v2392_v47 = vmax.f32 %v2385_v41, 0.0  ;;  %v6975_v55 = vpack.c.bf16 %v2389_v42, %v2389_v42  ;;  %v6977_v56 = vpack.c.bf16 %v2391_v43, %v2391_v43  ;;  %v5487_v38 = vld [vmem:[%s7499_s8 + $0x62c] ss:$28 sps:$4 sm:$0xff]   ;;  %v5490_v41 = vld [vmem:[%s7499_s8 + $0x274] ss:$28 sps:$4 sm:$0xff]  }
 0x33a   :  { %v2346_v48 = vpop.f32.mrf.mxu0  ;;  %v2387_v49 = vpop.f32.mrf.mxu1  ;;  %v5482_v39 = vld [vmem:[%s7499_s8 + $0x2a8] ss:$28 sps:$4 sm:$0xff]   ;;  %v5493_v42 = vld [vmem:[%s7499_s8 + $0x5f4] ss:$28 sps:$4 sm:$0xff]   ;;  %v5496_v45 = vld [vmem:[%s7499_s8 + $0x23c] ss:$28 sps:$4 sm:$0xff]  }
 0x33b   :  { %v6965_v50 = vpack.c.bf16 %v2390_v46, %v2390_v46  ;;  %v6967_v52 = vpack.c.bf16 %v2392_v47, %v2392_v47  ;;  %v5485_v40 = vld [vmem:[%s7499_s8 + $0x628] ss:$28 sps:$4 sm:$0xff]   ;;  %v5488_v43 = vld [vmem:[%s7499_s8 + $0x270] ss:$28 sps:$4 sm:$0xff]   ;;  %v5499_v46 = vld [vmem:[%s7499_s8 + $0x5bc] ss:$28 sps:$4 sm:$0xff]  }
 0x33c   :  { %v5491_v44 = vld [vmem:[%s7499_s8 + $0x5f0] ss:$28 sps:$4 sm:$0xff]   ;;  %v5494_v47 = vld [vmem:[%s7499_s8 + $0x238] ss:$28 sps:$4 sm:$0xff]   ;;  %v5502_v49 = vld [vmem:[%s7499_s8 + $0x204] ss:$28 sps:$4 sm:$0xff]  }
 0x33d   :  { %3874 = vmatprep.mubr.bf16.mxu0 %v6965_v50  ;;  %3915 = vmatprep.mubr.bf16.mxu1 %v6967_v52  ;;  %v5497_v48 = vld [vmem:[%s7499_s8 + $0x5b8] ss:$28 sps:$4 sm:$0xff]  }
 0x33e   :  { %3875 = vmatmul.mubr.bf16.vlgmr.msra.gmra.mxu0 %v6975_v55  ;;  %3916 = vmatmul.mubr.bf16.vlgmr.msra.gmra.mxu1 %v6977_v56 }
 0x33f   :  { %3925 = vmatpush1.bf16.msra.mxu0 %v5416_v53  ;;  %3966 = vmatpush1.bf16.msra.mxu1 %v5419_v54  ;;  %v5505_v53 = vld [vmem:[%s7499_s8 + $0x584] ss:$28 sps:$4 sm:$0xff]  }
 0x340   :  { %3956 = vmatprep.mubr.bf16.mxu0 %v6965_v50  ;;  %3997 = vmatprep.mubr.bf16.mxu1 %v6967_v52  ;;  %v5500_v54 = vld [vmem:[%s7499_s8 + $0x200] ss:$28 sps:$4 sm:$0xff]  }
 0x341   :  { %3926 = vmatprep.subr.bf16.mxu0 %v5424_v57  ;;  %3967 = vmatprep.subr.bf16.mxu1 %v5427_v58  ;;  %v5503_v57 = vld [vmem:[%s7499_s8 + $0x580] ss:$28 sps:$4 sm:$0xff]   ;;  %v5508_v58 = vld [vmem:[%s7499_s8 + $0x1cc] ss:$28 sps:$4 sm:$0xff]  }
 0x343   :  { %3927 = vmatpush1.bf16.msra.mxu0 %v5422_v59  ;;  %3968 = vmatpush1.bf16.msra.mxu1 %v5425_v62  ;;  %v5511_v59 = vld [vmem:[%s7499_s8 + $0x54c] ss:$28 sps:$4 sm:$0xff]  }
 0x344   :  { %3928 = vmatprep.subr.bf16.mxu0 %v5430_v63  ;;  %3969 = vmatprep.subr.bf16.mxu1 %v5433_v0  ;;  %v5506_v62 = vld [vmem:[%s7499_s8 + $0x1c8] ss:$28 sps:$4 sm:$0xff]   ;;  %v5514_v0 = vld [vmem:[%s7499_s8 + $0x19c] ss:$28 sps:$4 sm:$0xff]  }
 0x345   :  { %v5509_v63 = vld [vmem:[%s7499_s8 + $0x548] ss:$28 sps:$4 sm:$0xff]  }
 0x347   :  { %3929 = vmatpush1.bf16.msra.mxu0 %v5428_v1  ;;  %3970 = vmatpush1.bf16.msra.mxu1 %v5431_v2  ;;  %v5517_v1 = vld [vmem:[%s7499_s8 + $0x51c] ss:$28 sps:$4 sm:$0xff]  }
 0x348   :  { %3930 = vmatprep.subr.bf16.mxu0 %v5436_v3  ;;  %3971 = vmatprep.subr.bf16.mxu1 %v5439_v4  ;;  %v5512_v2 = vld [vmem:[%s7499_s8 + $0x198] ss:$28 sps:$4 sm:$0xff]   ;;  %v5520_v4 = vld [vmem:[%s7499_s8 + $0x164] ss:$28 sps:$4 sm:$0xff]  }
 0x349   :  { %v5515_v3 = vld [vmem:[%s7499_s8 + $0x518] ss:$28 sps:$4 sm:$0xff]  }
 0x34b   :  { %3931 = vmatpush1.bf16.msra.mxu0 %v5434_v5  ;;  %3972 = vmatpush1.bf16.msra.mxu1 %v5437_v8  ;;  %v5523_v5 = vld [vmem:[%s7499_s8 + $0x4e4] ss:$28 sps:$4 sm:$0xff]  }
 0x34c   :  { %3932 = vmatprep.subr.bf16.mxu0 %v5442_v9  ;;  %3973 = vmatprep.subr.bf16.mxu1 %v5445_v10  ;;  %v5518_v8 = vld [vmem:[%s7499_s8 + $0x160] ss:$28 sps:$4 sm:$0xff]   ;;  %v5526_v10 = vld [vmem:[%s7499_s8 + $0x12c] ss:$28 sps:$4 sm:$0xff]  }
 0x34d   :  { %v5521_v9 = vld [vmem:[%s7499_s8 + $0x4e0] ss:$28 sps:$4 sm:$0xff]  }
 0x34f   :  { %3933 = vmatpush1.bf16.msra.mxu0 %v5440_v11  ;;  %3974 = vmatpush1.bf16.msra.mxu1 %v5443_v12  ;;  %v5529_v11 = vld [vmem:[%s7499_s8 + $0x4ac] ss:$28 sps:$4 sm:$0xff]  }
 0x350   :  { %3934 = vmatprep.subr.bf16.mxu0 %v5448_v15  ;;  %3975 = vmatprep.subr.bf16.mxu1 %v5451_v16  ;;  %v5524_v12 = vld [vmem:[%s7499_s8 + $0x128] ss:$28 sps:$4 sm:$0xff]   ;;  %v5532_v16 = vld [vmem:[%s7499_s8 + $0xf4] ss:$28 sps:$4 sm:$0xff]  }
 0x351   :  { %v5527_v15 = vld [vmem:[%s7499_s8 + $0x4a8] ss:$28 sps:$4 sm:$0xff]  }
 0x353   :  { %3935 = vmatpush1.bf16.msra.mxu0 %v5446_v17  ;;  %3976 = vmatpush1.bf16.msra.mxu1 %v5449_v18  ;;  %v5535_v17 = vld [vmem:[%s7499_s8 + $0x474] ss:$28 sps:$4 sm:$0xff]  }
 0x354   :  { %3936 = vmatprep.subr.bf16.mxu0 %v5454_v19  ;;  %3977 = vmatprep.subr.bf16.mxu1 %v5457_v20  ;;  %v5530_v18 = vld [vmem:[%s7499_s8 + $0xf0] ss:$28 sps:$4 sm:$0xff]   ;;  %v5538_v20 = vld [vmem:[%s7499_s8 + $0xbc] ss:$28 sps:$4 sm:$0xff]  }
 0x355   :  { %v5533_v19 = vld [vmem:[%s7499_s8 + $0x470] ss:$28 sps:$4 sm:$0xff]  }
 0x357   :  { %3937 = vmatpush1.bf16.msra.mxu0 %v5452_v21  ;;  %3978 = vmatpush1.bf16.msra.mxu1 %v5455_v22  ;;  %v5541_v21 = vld [vmem:[%s7499_s8 + $0x43c] ss:$28 sps:$4 sm:$0xff]  }
 0x358   :  { %3938 = vmatprep.subr.bf16.mxu0 %v5460_v23  ;;  %3979 = vmatprep.subr.bf16.mxu1 %v5463_v24  ;;  %v5536_v22 = vld [vmem:[%s7499_s8 + $0xb8] ss:$28 sps:$4 sm:$0xff]   ;;  %v5544_v24 = vld [vmem:[%s7499_s8 + $0x84] ss:$28 sps:$4 sm:$0xff]  }
 0x359   :  { %v5539_v23 = vld [vmem:[%s7499_s8 + $0x438] ss:$28 sps:$4 sm:$0xff]  }
 0x35b   :  { %3939 = vmatpush1.bf16.msra.mxu0 %v5458_v7  ;;  %3980 = vmatpush1.bf16.msra.mxu1 %v5461_v25  ;;  %v5547_v7 = vld [vmem:[%s7499_s8 + $0x404] ss:$28 sps:$4 sm:$0xff]  }
 0x35c   :  { %3940 = vmatprep.subr.bf16.mxu0 %v5466_v26  ;;  %3981 = vmatprep.subr.bf16.mxu1 %v5469_v27  ;;  %v5542_v25 = vld [vmem:[%s7499_s8 + $0x80] ss:$28 sps:$4 sm:$0xff]   ;;  %v5550_v27 = vld [vmem:[%s7499_s8 + $0x4c] ss:$28 sps:$4 sm:$0xff]  }
 0x35d   :  { %v5545_v26 = vld [vmem:[%s7499_s8 + $0x400] ss:$28 sps:$4 sm:$0xff]  }
 0x35f   :  { %3941 = vmatpush2.bf16.msra.mxu0 %v5464_v14  ;;  %3982 = vmatpush2.bf16.msra.mxu1 %v5467_v51  ;;  %v5553_v14 = vld [vmem:[%s7499_s8 + $0x3cc] ss:$28 sps:$4 sm:$0xff]  }
 0x360   :  { %3942 = vmatprep.subr.bf16.mxu0 %v5472_v28  ;;  %3983 = vmatprep.subr.bf16.mxu1 %v5475_v29  ;;  %v5548_v51 = vld [vmem:[%s7499_s8 + $0x48] ss:$28 sps:$4 sm:$0xff]   ;;  %v5556_v29 = vld [vmem:[%s7499_s8 + $0x14] ss:$28 sps:$4 sm:$0xff]  }
 0x361   :  { %v5551_v28 = vld [vmem:[%s7499_s8 + $0x3c8] ss:$28 sps:$4 sm:$0xff]  }
 0x363   :  { %3943 = vmatpush2.bf16.msra.mxu0 %v5470_v30  ;;  %3984 = vmatpush2.bf16.msra.mxu1 %v5473_v6  ;;  %v5559_v30 = vld [vmem:[%s7499_s8 + $0x394] ss:$28 sps:$4 sm:$0xff]  }
 0x364   :  { %3944 = vmatprep.subr.bf16.mxu0 %v5478_v31  ;;  %3985 = vmatprep.subr.bf16.mxu1 %v5481_v13  ;;  %v5554_v6 = vld [vmem:[%s7499_s8 + $0x10] ss:$28 sps:$4 sm:$0xff]   ;;  %v5562_v13 = vld [vmem:[%s7499_s8 + $0x35c] ss:$28 sps:$4 sm:$0xff]  }
 0x365   :  { %v5557_v31 = vld [vmem:[%s7499_s8 + $0x390] ss:$28 sps:$4 sm:$0xff]  }
 0x367   :  { %3945 = vmatpush2.bf16.msra.mxu0 %v5476_v32  ;;  %3986 = vmatpush2.bf16.msra.mxu1 %v5479_v35  ;;  %v5565_v32 = vld [vmem:[%s7499_s8 + $0x6dc] ss:$28 sps:$4 sm:$0xff]  }
 0x368   :  { %3946 = vmatprep.subr.bf16.mxu0 %v5484_v37  ;;  %3987 = vmatprep.subr.bf16.mxu1 %v5487_v38  ;;  %v5560_v35 = vld [vmem:[%s7499_s8 + $0x358] ss:$28 sps:$4 sm:$0xff]   ;;  %v5568_v38 = vld [vmem:[%s7499_s8 + $0x324] ss:$28 sps:$4 sm:$0xff]  }
 0x369   :  { %v5563_v37 = vld [vmem:[%s7499_s8 + $0x6d8] ss:$28 sps:$4 sm:$0xff]  }
 0x36b   :  { %3947 = vmatpush2.bf16.msra.mxu0 %v5482_v39  ;;  %3988 = vmatpush2.bf16.msra.mxu1 %v5485_v40  ;;  %v5571_v39 = vld [vmem:[%s7499_s8 + $0x6a4] ss:$28 sps:$4 sm:$0xff]  }
 0x36c   :  { %3948 = vmatprep.subr.bf16.mxu0 %v5490_v41  ;;  %3989 = vmatprep.subr.bf16.mxu1 %v5493_v42  ;;  %v5566_v40 = vld [vmem:[%s7499_s8 + $0x320] ss:$28 sps:$4 sm:$0xff]   ;;  %v5574_v42 = vld [vmem:[%s7499_s8 + $0x2ec] ss:$28 sps:$4 sm:$0xff]  }
 0x36d   :  { %v5569_v41 = vld [vmem:[%s7499_s8 + $0x6a0] ss:$28 sps:$4 sm:$0xff]  }
 0x36f   :  { %3949 = vmatpush2.bf16.msra.mxu0 %v5488_v43  ;;  %3990 = vmatpush2.bf16.msra.mxu1 %v5491_v44  ;;  %v5577_v43 = vld [vmem:[%s7499_s8 + $0x66c] ss:$28 sps:$4 sm:$0xff]  }
 0x370   :  { %3950 = vmatprep.subr.bf16.mxu0 %v5496_v45  ;;  %3991 = vmatprep.subr.bf16.mxu1 %v5499_v46  ;;  %v5572_v44 = vld [vmem:[%s7499_s8 + $0x2e8] ss:$28 sps:$4 sm:$0xff]   ;;  %v5580_v46 = vld [vmem:[%s7499_s8 + $0x2b4] ss:$28 sps:$4 sm:$0xff]  }
 0x371   :  { %v5575_v45 = vld [vmem:[%s7499_s8 + $0x668] ss:$28 sps:$4 sm:$0xff]  }
 0x373   :  { %3951 = vmatpush2.bf16.msra.mxu0 %v5494_v47  ;;  %3992 = vmatpush2.bf16.msra.mxu1 %v5497_v48  ;;  %v5583_v47 = vld [vmem:[%s7499_s8 + $0x634] ss:$28 sps:$4 sm:$0xff]  }
 0x374   :  { %3952 = vmatprep.subr.bf16.mxu0 %v5502_v49  ;;  %3993 = vmatprep.subr.bf16.mxu1 %v5505_v53  ;;  %v5578_v48 = vld [vmem:[%s7499_s8 + $0x2b0] ss:$28 sps:$4 sm:$0xff]   ;;  %v5586_v53 = vld [vmem:[%s7499_s8 + $0x27c] ss:$28 sps:$4 sm:$0xff]  }
 0x375   :  { %v5581_v49 = vld [vmem:[%s7499_s8 + $0x630] ss:$28 sps:$4 sm:$0xff]  }
 0x377   :  { %3953 = vmatpush2.bf16.msra.mxu0 %v5500_v54  ;;  %3994 = vmatpush2.bf16.msra.mxu1 %v5503_v57  ;;  %v5589_v54 = vld [vmem:[%s7499_s8 + $0x5fc] ss:$28 sps:$4 sm:$0xff]  }
 0x378   :  { %3954 = vmatprep.subr.bf16.mxu0 %v5508_v58  ;;  %3995 = vmatprep.subr.bf16.mxu1 %v5511_v59  ;;  %v5584_v57 = vld [vmem:[%s7499_s8 + $0x278] ss:$28 sps:$4 sm:$0xff]   ;;  %v5592_v59 = vld [vmem:[%s7499_s8 + $0x244] ss:$28 sps:$4 sm:$0xff]  }
 0x379   :  { %v5587_v58 = vld [vmem:[%s7499_s8 + $0x5f8] ss:$28 sps:$4 sm:$0xff]  }
 0x37b   :  { %3955 = vmatpush2.bf16.msra.mxu0 %v5506_v62  ;;  %3996 = vmatpush2.bf16.msra.mxu1 %v5509_v63  ;;  %v5595_v62 = vld [vmem:[%s7499_s8 + $0x5c4] ss:$28 sps:$4 sm:$0xff]  }
 0x37c   :  { %4006 = vmatprep.subr.bf16.mxu0 %v5514_v0  ;;  %4047 = vmatprep.subr.bf16.mxu1 %v5517_v1  ;;  %v5590_v63 = vld [vmem:[%s7499_s8 + $0x240] ss:$28 sps:$4 sm:$0xff]   ;;  %v5598_v1 = vld [vmem:[%s7499_s8 + $0x20c] ss:$28 sps:$4 sm:$0xff]  }
 0x37d   :  { %v5593_v0 = vld [vmem:[%s7499_s8 + $0x5c0] ss:$28 sps:$4 sm:$0xff]  }
 0x37e   :  { %3957 = vmatmul.mubr.bf16.vlgmr.msra.gmra.mxu0 %v6975_v55  ;;  %3998 = vmatmul.mubr.bf16.vlgmr.msra.gmra.mxu1 %v6977_v56 }
 0x37f   :  { %4007 = vmatpush1.bf16.msra.mxu0 %v5512_v2  ;;  %4038 = vmatprep.mubr.bf16.mxu0 %v6965_v50  ;;  %v5601_v2 = vld [vmem:[%s7499_s8 + $0x58c] ss:$28 sps:$4 sm:$0xff]  }
 0x380   :  { %4048 = vmatpush1.bf16.msra.mxu1 %v5515_v3  ;;  %4079 = vmatprep.mubr.bf16.mxu1 %v6967_v52  ;;  %v5596_v3 = vld [vmem:[%s7499_s8 + $0x208] ss:$28 sps:$4 sm:$0xff]  }
 0x381   :  { %4008 = vmatprep.subr.bf16.mxu0 %v5520_v4  ;;  %4049 = vmatprep.subr.bf16.mxu1 %v5523_v5  ;;  %v5599_v4 = vld [vmem:[%s7499_s8 + $0x588] ss:$28 sps:$4 sm:$0xff]   ;;  %v5604_v5 = vld [vmem:[%s7499_s8 + $0x1d4] ss:$28 sps:$4 sm:$0xff]  }
 0x383   :  { %4009 = vmatpush1.bf16.msra.mxu0 %v5518_v8  ;;  %v5607_v8 = vld [vmem:[%s7499_s8 + $0x554] ss:$28 sps:$4 sm:$0xff]  }
 0x384   :  { %4050 = vmatpush1.bf16.msra.mxu1 %v5521_v9  ;;  %4010 = vmatprep.subr.bf16.mxu0 %v5526_v10  ;;  %v5602_v9 = vld [vmem:[%s7499_s8 + $0x1d0] ss:$28 sps:$4 sm:$0xff]  }
 0x385   :  { %4051 = vmatprep.subr.bf16.mxu1 %v5529_v11  ;;  %v5605_v10 = vld [vmem:[%s7499_s8 + $0x550] ss:$28 sps:$4 sm:$0xff]   ;;  %v5608_v11 = vld [vmem:[%s7499_s8 + $0x360] ss:$28 sps:$4 sm:$0xff]  }
 0x387   :  { %4011 = vmatpush1.bf16.msra.mxu0 %v5524_v12  ;;  %v5609_v12 = vld [vmem:[%s7499_s8 + $0x6e0] ss:$28 sps:$4 sm:$0xff]  }
 0x388   :  { %4052 = vmatpush1.bf16.msra.mxu1 %v5527_v15  ;;  %4012 = vmatprep.subr.bf16.mxu0 %v5532_v16  ;;  %v5610_v15 = vld [vmem:[%s7499_s8 + $0x1a0] ss:$28 sps:$4 sm:$0xff]  }
 0x389   :  { %4053 = vmatprep.subr.bf16.mxu1 %v5535_v17  ;;  %v5611_v16 = vld [vmem:[%s7499_s8 + $0x520] ss:$28 sps:$4 sm:$0xff]   ;;  %v5612_v17 = vld [vmem:[%s7499_s8 + $0x328] ss:$28 sps:$4 sm:$0xff]  }
 0x38b   :  { %4013 = vmatpush1.bf16.msra.mxu0 %v5530_v18  ;;  %v5613_v18 = vld [vmem:[%s7499_s8 + $0x6a8] ss:$28 sps:$4 sm:$0xff]  }
 0x38c   :  { %4054 = vmatpush1.bf16.msra.mxu1 %v5533_v19  ;;  %4014 = vmatprep.subr.bf16.mxu0 %v5538_v20  ;;  %v5614_v19 = vld [vmem:[%s7499_s8 + $0x168] ss:$28 sps:$4 sm:$0xff]  }
 0x38d   :  { %4055 = vmatprep.subr.bf16.mxu1 %v5541_v21  ;;  %v5615_v20 = vld [vmem:[%s7499_s8 + $0x4e8] ss:$28 sps:$4 sm:$0xff]   ;;  %v5616_v21 = vld [vmem:[%s7499_s8 + $0x2f0] ss:$28 sps:$4 sm:$0xff]  }
 0x38f   :  { %4015 = vmatpush1.bf16.msra.mxu0 %v5536_v22  ;;  %v5617_v22 = vld [vmem:[%s7499_s8 + $0x670] ss:$28 sps:$4 sm:$0xff]  }
 0x390   :  { %4056 = vmatpush1.bf16.msra.mxu1 %v5539_v23  ;;  %4016 = vmatprep.subr.bf16.mxu0 %v5544_v24  ;;  %v5619_v23 = vld [vmem:[%s7499_s8 + $0x4b0] ss:$28 sps:$4 sm:$0xff]   ;;  %v5621_v24 = vld [vmem:[%s7499_s8 + $0x638] ss:$28 sps:$4 sm:$0xff]  }
 0x391   :  { %4057 = vmatprep.subr.bf16.mxu1 %v5547_v7  ;;  %v5622_v7 = vld [vmem:[%s7499_s8 + $0xf8] ss:$28 sps:$4 sm:$0xff]  }
 0x393   :  { %4017 = vmatpush1.bf16.msra.mxu0 %v5542_v25  ;;  %v5623_v25 = vld [vmem:[%s7499_s8 + $0x478] ss:$28 sps:$4 sm:$0xff]  }
 0x394   :  { %4058 = vmatpush1.bf16.msra.mxu1 %v5545_v26  ;;  %4018 = vmatprep.subr.bf16.mxu0 %v5550_v27  ;;  %v5624_v26 = vld [vmem:[%s7499_s8 + $0x280] ss:$28 sps:$4 sm:$0xff]  }
 0x395   :  { %4059 = vmatprep.subr.bf16.mxu1 %v5553_v14  ;;  %v5625_v27 = vld [vmem:[%s7499_s8 + $0x600] ss:$28 sps:$4 sm:$0xff]  }
 0x396   :  { %v5626_v14 = vld [vmem:[%s7499_s8 + $0xc0] ss:$28 sps:$4 sm:$0xff]  }
 0x397   :  { %4019 = vmatpush1.bf16.msra.mxu0 %v5548_v51  ;;  %v5627_v51 = vld [vmem:[%s7499_s8 + $0x440] ss:$28 sps:$4 sm:$0xff]  }
 0x398   :  { %4060 = vmatpush1.bf16.msra.mxu1 %v5551_v28  ;;  %4020 = vmatprep.subr.bf16.mxu0 %v5556_v29  ;;  %v5628_v28 = vld [vmem:[%s7499_s8 + $0x248] ss:$28 sps:$4 sm:$0xff]  }
 0x399   :  { %4061 = vmatprep.subr.bf16.mxu1 %v5559_v30  ;;  %v5629_v29 = vld [vmem:[%s7499_s8 + $0x5c8] ss:$28 sps:$4 sm:$0xff]  }
 0x39a   :  { %v5630_v30 = vld [vmem:[%s7499_s8 + $0x88] ss:$28 sps:$4 sm:$0xff]  }
 0x39b   :  { %4021 = vmatpush1.bf16.msra.mxu0 %v5554_v6  ;;  %v5631_v6 = vld [vmem:[%s7499_s8 + $0x408] ss:$28 sps:$4 sm:$0xff]  }
 0x39c   :  { %4062 = vmatpush1.bf16.msra.mxu1 %v5557_v31  ;;  %4022 = vmatprep.subr.bf16.mxu0 %v5562_v13  ;;  %v5632_v31 = vld [vmem:[%s7499_s8 + $0x210] ss:$28 sps:$4 sm:$0xff]  }
 0x39d   :  { %4063 = vmatprep.subr.bf16.mxu1 %v5565_v32  ;;  %v5633_v13 = vld [vmem:[%s7499_s8 + $0x590] ss:$28 sps:$4 sm:$0xff]  }
 0x39e   :  { %v5634_v32 = vld [vmem:[%s7499_s8 + $0x50] ss:$28 sps:$4 sm:$0xff]  }
 0x39f   :  { %4023 = vmatpush2.bf16.msra.mxu0 %v5560_v35  ;;  %v5635_v35 = vld [vmem:[%s7499_s8 + $0x3d0] ss:$28 sps:$4 sm:$0xff]  }
 0x3a0   :  { %4064 = vmatpush2.bf16.msra.mxu1 %v5563_v37  ;;  %4024 = vmatprep.subr.bf16.mxu0 %v5568_v38  ;;  %v5636_v37 = vld [vmem:[%s7499_s8 + $0x1d8] ss:$28 sps:$4 sm:$0xff]  }
 0x3a1   :  { %4065 = vmatprep.subr.bf16.mxu1 %v5571_v39  ;;  %v5637_v38 = vld [vmem:[%s7499_s8 + $0x558] ss:$28 sps:$4 sm:$0xff]  }
 0x3a2   :  { %v5638_v39 = vld [vmem:[%s7499_s8 + $0x18] ss:$28 sps:$4 sm:$0xff]  }
 0x3a3   :  { %4025 = vmatpush2.bf16.msra.mxu0 %v5566_v40  ;;  %v5639_v40 = vld [vmem:[%s7499_s8 + $0x398] ss:$28 sps:$4 sm:$0xff]  }
 0x3a4   :  { %4066 = vmatpush2.bf16.msra.mxu1 %v5569_v41  ;;  %4026 = vmatprep.subr.bf16.mxu0 %v5574_v42  ;;  %v7466_v41 = vld [vmem:[%s7500_s9] sm:$0x7f] }
 0x3a5   :  { %4067 = vmatprep.subr.bf16.mxu1 %v5577_v43  ;;  %v2658_v42 = vrot.slane %v7466_v41, %v6636_v34  ;;  %v2662_v43 = vrot.slane %v7466_v41, %v6642_v36 }
 0x3a7   :  { %4027 = vmatpush2.bf16.msra.mxu0 %v5572_v44 }
 0x3a8   :  { %4068 = vmatpush2.bf16.msra.mxu1 %v5575_v45  ;;  %4028 = vmatprep.subr.bf16.mxu0 %v5580_v46 }
 0x3a9   :  { %4069 = vmatprep.subr.bf16.mxu1 %v5583_v47 }
 0x3ab   :  { %4029 = vmatpush2.bf16.msra.mxu0 %v5578_v48 }
 0x3ac   :  { %4070 = vmatpush2.bf16.msra.mxu1 %v5581_v49  ;;  %4030 = vmatprep.subr.bf16.mxu0 %v5586_v53 }
 0x3ad   :  { %4071 = vmatprep.subr.bf16.mxu1 %v5589_v54 }
 0x3af   :  { %4031 = vmatpush2.bf16.msra.mxu0 %v5584_v57 }
 0x3b0   :  { %4072 = vmatpush2.bf16.msra.mxu1 %v5587_v58  ;;  %4032 = vmatprep.subr.bf16.mxu0 %v5592_v59 }
 0x3b1   :  { %4073 = vmatprep.subr.bf16.mxu1 %v5595_v62 }
 0x3b3   :  { %4033 = vmatpush2.bf16.msra.mxu0 %v5590_v63 }
 0x3b4   :  { %4074 = vmatpush2.bf16.msra.mxu1 %v5593_v0  ;;  %4034 = vmatprep.subr.bf16.mxu0 %v5598_v1 }
 0x3b5   :  { %4075 = vmatprep.subr.bf16.mxu1 %v5601_v2 }
 0x3b7   :  { %4035 = vmatpush2.bf16.msra.mxu0 %v5596_v3 }
 0x3b8   :  { %4076 = vmatpush2.bf16.msra.mxu1 %v5599_v4  ;;  %4036 = vmatprep.subr.bf16.mxu0 %v5604_v5  ;;  %v2666_v4 = vrot.slane %v7466_v41, %v6648_v60 }
 0x3b9   :  { %4077 = vmatprep.subr.bf16.mxu1 %v5607_v8 }
 0x3bb   :  { %4037 = vmatpush2.bf16.msra.mxu0 %v5602_v9 }
 0x3bc   :  { %4078 = vmatpush2.bf16.msra.mxu1 %v5605_v10  ;;  %4827 = vmatprep.subr.bf16.mxu0 %v5608_v11 }
 0x3bd   :  { %4849 = vmatprep.subr.bf16.mxu1 %v5609_v12 }
 0x3be   :  { %4039 = vmatmul.mubr.bf16.vlgmr.msra.gmra.mxu0 %v6975_v55 }
 0x3bf   :  { %4080 = vmatmul.mubr.bf16.vlgmr.msra.gmra.mxu1 %v6977_v56  ;;  %4828 = vmatpush3.bf16.msra.mxu0 %v5610_v15 }
 0x3c0   :  { %4120 = vmatprep.mubr.bf16.mxu0 %v6965_v50  ;;  %4850 = vmatpush3.bf16.msra.mxu1 %v5611_v16  ;;  %v5618_v50 = vld [vmem:[%s7499_s8 + $0x130] ss:$28 sps:$4 sm:$0xff]  }
 0x3c1   :  { %4160 = vmatprep.mubr.bf16.mxu1 %v6967_v52  ;;  %4829 = vmatprep.subr.bf16.mxu0 %v5612_v17  ;;  %v5620_v52 = vld [vmem:[%s7499_s8 + $0x2b8] ss:$28 sps:$4 sm:$0xff]   ;;  %s5736_s8 = smov [#allocation4]  }
 0x3c2   :  { %4851 = vmatprep.subr.bf16.mxu1 %v5613_v18  ;;  %s4262_s9 = sshll.u32 %s5736_s8, 4  ;;  %s4263_s9 = int_to_ptr.vmem [resolvable:$true] %s4262_s9 }
 0x3c3   :  { %4830 = vmatpush3.bf16.msra.mxu0 %v5614_v19  ;;  %s5671_s28 = scalar_lea.vmem %s4263_s9, 128  ;;  %p5676_p1 = scmp.lt.s32.totalorder %s4263_s9, %s4263_s9 }
 0x3c4   :  { %4852 = vmatpush3.bf16.msra.mxu1 %v5615_v20  ;;  %4831 = vmatprep.subr.bf16.mxu0 %v5616_v21  ;;  %p5672_p0 = scmp.ne.s32.totalorder %s4263_s9, %s5671_s28  ;;  %p5677_p2 = scmp.lt.s32.totalorder %s5671_s28, %s5671_s28 }
 0x3c5   :  { %4853 = vmatprep.subr.bf16.mxu1 %v5617_v22 }
 0x3c6   :  { %p5678_p3 = por %p5677_p2, %p5676_p1 }
 0x3c7   :  { %4832 = vmatpush3.bf16.msra.mxu0 %v5618_v50 }
 0x3c8   :  { %4854 = vmatpush3.bf16.msra.mxu1 %v5619_v23  ;;  %4833 = vmatprep.subr.bf16.mxu0 %v5620_v52  ;;  %p5679_p4 = pnand %p5678_p3, %p5672_p0 }
 0x3c9   :  { %4855 = vmatprep.subr.bf16.mxu1 %v5621_v24 }
 0x3cb   :  { %4834 = vmatpush3.bf16.msra.mxu0 %v5622_v7 }
 0x3cc   :  { %4856 = vmatpush3.bf16.msra.mxu1 %v5623_v25  ;;  %4835 = vmatprep.subr.bf16.mxu0 %v5624_v26 }
 0x3cd   :  { %4857 = vmatprep.subr.bf16.mxu1 %v5625_v27 }
 0x3cf   :  { %4836 = vmatpush3.bf16.msra.mxu0 %v5626_v14 }
 0x3d0   :  { %4858 = vmatpush3.bf16.msra.mxu1 %v5627_v51  ;;  %4837 = vmatprep.subr.bf16.mxu0 %v5628_v28 }
 0x3d1   :  { %4859 = vmatprep.subr.bf16.mxu1 %v5629_v29 }
 0x3d3   :  { %4838 = vmatpush3.bf16.msra.mxu0 %v5630_v30 }
 0x3d4   :  { %4860 = vmatpush3.bf16.msra.mxu1 %v5631_v6  ;;  %4839 = vmatprep.subr.bf16.mxu0 %v5632_v31 }
 0x3d5   :  { %4861 = vmatprep.subr.bf16.mxu1 %v5633_v13 }
 0x3d7   :  { %4840 = vmatpush3.bf16.msra.mxu0 %v5634_v32 }
 0x3d8   :  { %4862 = vmatpush3.bf16.msra.mxu1 %v5635_v35  ;;  %4841 = vmatprep.subr.bf16.mxu0 %v5636_v37 }
 0x3d9   :  { %4863 = vmatprep.subr.bf16.mxu1 %v5637_v38 }
 0x3db   :  { %4842 = vmatpush3.bf16.msra.mxu0 %v5638_v39 }
 0x3dc   :  { %4864 = vmatpush3.bf16.msra.mxu1 %v5639_v40 }
 0x3de   :  { %4121 = vmatmul.mubr.bf16.vlgmr.msra.gmra.mxu0 %v6975_v55 }
 0x3df   :  { %4161 = vmatmul.mubr.bf16.vlgmr.msra.gmra.mxu1 %v6977_v56 }
 0x3fe   :  { %v3876_v44 = vpop.f32.mrf.mxu0  ;;  %v3917_v45 = vpop.f32.mrf.mxu1 }
 0x3ff   :  { %v3877_v46 = vadd.f32 %v3876_v44, %v2658_v42 }
 0x400   :  { %v3878_v47 = vpop.f32.mrf.mxu0  ;;  %v3919_v48 = vpop.f32.mrf.mxu1 }
 0x401   :  { %v3918_v49 = vadd.f32 %v3917_v45, %v3877_v46  ;;  %v3879_v55 = vadd.f32 %v3878_v47, %v2662_v43 }
 0x402   :  { %v3880_v53 = vpop.f32.mrf.mxu0  ;;  %v3921_v56 = vpop.f32.mrf.mxu1 }
 0x403   :  { %v4812_v54 = vmul.f32 -1.442695, %v3918_v49  ;;  %v3920_v57 = vadd.f32 %v3919_v48, %v3879_v55 }
 0x404   :  { %v3881_v58 = vpop.f32.mrf.mxu0  ;;  %v3922_v59 = vpop.f32.mrf.mxu1 }
 0x405   :  { %5642 = vpow2.f32 %v4812_v54  ;;  %v4813_v62 = vmul.f32 -1.442695, %v3920_v57 }
 0x407   :  { %5644 = vpow2.f32 %v4813_v62 }
 0x412   :  { %v5643_v34 = vpop.eup %5642 }
 0x413   :  { %v4189_v63 = vadd.f32 1.0, %v5643_v34 }
 0x414   :  { %v5645_v0 = vpop.eup %5644 }
 0x415   :  { %v4190_v36 = vadd.f32 1.0, %v5645_v0  ;;  %5646 = vrcp.f32 %v4189_v63 }
 0x417   :  { %5648 = vrcp.f32 %v4190_v36 }
 0x422   :  { %v5647_v1 = vpop.eup %5646 }
 0x424   :  { %v5649_v2 = vpop.eup %5648 }
 0x425   :  { %v4823_v3 = vpack.c.bf16 %v5649_v2, %v5647_v1 }
 0x427   :  { %4239 = vst [vmem:[#allocation2] sm:$0xff] %v4823_v3 }
 0x428   :  { %5682 = shalt.err (!%p5679_p4)
}
 0x429   :  { %4265 = dma.vmem_to_hbm [thread:$0]  %s4263_s9, 128, %s7502_s11, [#allocation5]   ;;  %v2670_v5 = vrot.slane %v7466_v41, %v6651_v61 }
 0x42a   :  { %s5737_s11 = smov [#allocation6]  }
 0x42b   :  { %s4272_s13 = sshll.u32 %s5737_s11, 4  ;;  %s4273_s13 = int_to_ptr.vmem [resolvable:$true] %s4272_s13 }
 0x42c   :  { %s5691_s14 = scalar_lea.vmem %s4273_s13, 128  ;;  %p5696_p6 = scmp.lt.s32.totalorder %s4273_s13, %s4273_s13 }
 0x42d   :  { %p5692_p5 = scmp.ne.s32.totalorder %s4273_s13, %s5691_s14  ;;  %p5697_p7 = scmp.lt.s32.totalorder %s5691_s14, %s5691_s14 }
 0x42f   :  { %p5698_p8 = por %p5697_p7, %p5696_p6 }
 0x431   :  { %p5699_p9 = pnand %p5698_p8, %p5692_p5 }
 0x43e   :  { %v3958_v8 = vpop.f32.mrf.mxu0  ;;  %v3999_v9 = vpop.f32.mrf.mxu1 }
 0x43f   :  { %v3959_v10 = vadd.f32 %v3958_v8, %v2666_v4 }
 0x440   :  { %v3960_v11 = vpop.f32.mrf.mxu0  ;;  %v4001_v60 = vpop.f32.mrf.mxu1 }
 0x441   :  { %v4000_v12 = vadd.f32 %v3999_v9, %v3959_v10  ;;  %v3961_v15 = vadd.f32 %v3960_v11, %v2670_v5 }
 0x442   :  { %v3962_v16 = vpop.f32.mrf.mxu0  ;;  %v4003_v17 = vpop.f32.mrf.mxu1 }
 0x443   :  { %v4814_v18 = vmul.f32 -1.442695, %v4000_v12  ;;  %v4002_v19 = vadd.f32 %v4001_v60, %v3961_v15 }
 0x444   :  { %v3963_v20 = vpop.f32.mrf.mxu0  ;;  %v4004_v21 = vpop.f32.mrf.mxu1 }
 0x445   :  { %5650 = vpow2.f32 %v4814_v18  ;;  %v4815_v22 = vmul.f32 -1.442695, %v4002_v19 }
 0x447   :  { %5652 = vpow2.f32 %v4815_v22 }
 0x448   :  { %5702 = shalt.err (!%p5699_p9)
}
 0x449   :  { %4275 = dma.vmem_to_hbm [thread:$0]  %s4273_s13, 128, %s7503_s12, [#allocation5]   ;;  %v2673_v26 = vsub.s32 4, %v6633_v33  ;;  %v2677_v27 = vsub.s32 5, %v6633_v33  ;;  %v2681_v48 = vsub.s32 6, %v6633_v33  ;;  %vm4242_vm1 = vcmask 125952  }
 0x44a   :  { %s5738_s12 = smov [#allocation2]  }
 0x44b   :  { %v2674_v14 = vrot.slane %v7466_v41, %v2673_v26  ;;  %v2678_v51 = vrot.slane %v7466_v41, %v2677_v27  ;;  %v2682_v53 = vrot.slane %v7466_v41, %v2681_v48  ;;  %s4252_s16 = sshll.u32 %s5738_s12, 4  ;;  %s4253_s16 = int_to_ptr.vmem [resolvable:$true] %s4252_s16 }
 0x44c   :  { %s5711_s17 = scalar_lea.vmem %s4253_s16, 448  ;;  %p5716_p11 = scmp.lt.s32.totalorder %s4253_s16, %s4253_s16 }
 0x44d   :  { %p5712_p10 = scmp.ne.s32.totalorder %s4253_s16, %s5711_s17  ;;  %p5717_p12 = scmp.lt.s32.totalorder %s5711_s17, %s5711_s17 }
 0x44f   :  { %p5718_p13 = por %p5717_p12, %p5716_p11 }
 0x451   :  { %p5719_p0 = pnand %p5718_p13, %p5712_p10 }
 0x452   :  { %v5651_v61 = vpop.eup %5650 }
 0x453   :  { %v4191_v50 = vadd.f32 1.0, %v5651_v61 }
 0x454   :  { %v5653_v23 = vpop.eup %5652 }
 0x455   :  { %v4192_v52 = vadd.f32 1.0, %v5653_v23  ;;  %5654 = vrcp.f32 %v4191_v50 }
 0x457   :  { %5656 = vrcp.f32 %v4192_v52 }
 0x462   :  { %v5655_v24 = vpop.eup %5654 }
 0x464   :  { %v5657_v7 = vpop.eup %5656 }
 0x465   :  { %v4824_v25 = vpack.c.bf16 %v5657_v7, %v5655_v24 }
 0x467   :  { %4240 = vst [vmem:[#allocation2 + $0x8] sm:$0xff] %v4824_v25 }
 0x47e   :  { %v4040_v28 = vpop.f32.mrf.mxu0 }
 0x47f   :  { %v4041_v29 = vadd.f32 %v4040_v28, %v2674_v14  ;;  %v4081_v30 = vpop.f32.mrf.mxu1 }
 0x480   :  { %v4042_v6 = vpop.f32.mrf.mxu0 }
 0x481   :  { %v4082_v31 = vadd.f32 %v4081_v30, %v4041_v29  ;;  %v4043_v13 = vadd.f32 %v4042_v6, %v2678_v51  ;;  %v4083_v32 = vpop.f32.mrf.mxu1 }
 0x482   :  { %v4044_v35 = vpop.f32.mrf.mxu0 }
 0x483   :  { %v4816_v37 = vmul.f32 -1.442695, %v4082_v31  ;;  %v4084_v38 = vadd.f32 %v4083_v32, %v4043_v13  ;;  %v4085_v39 = vpop.f32.mrf.mxu1 }
 0x484   :  { %v4045_v40 = vpop.f32.mrf.mxu0 }
 0x485   :  { %5658 = vpow2.f32 %v4816_v37  ;;  %v4817_v42 = vmul.f32 -1.442695, %v4084_v38  ;;  %v4086_v43 = vpop.f32.mrf.mxu1 }
 0x487   :  { %5660 = vpow2.f32 %v4817_v42 }
 0x492   :  { %v5659_v44 = vpop.eup %5658 }
 0x493   :  { %v4193_v45 = vadd.f32 1.0, %v5659_v44 }
 0x494   :  { %v5661_v46 = vpop.eup %5660 }
 0x495   :  { %v4194_v47 = vadd.f32 1.0, %v5661_v46  ;;  %5662 = vrcp.f32 %v4193_v45 }
 0x497   :  { %5664 = vrcp.f32 %v4194_v47 }
 0x49e   :  { %v4843_v49 = vpop.f32.mrf.mxu0 }
 0x49f   :  { %v4865_v55 = vpop.f32.mrf.mxu1 }
 0x4a0   :  { %v4844_v56 = vpop.f32.mrf.mxu0 }
 0x4a1   :  { %v4845_v54 = vadd.f32 %v4844_v56, %v4843_v49  ;;  %v4866_v57 = vpop.f32.mrf.mxu1 }
 0x4a2   :  { %v4846_v58 = vpop.f32.mrf.mxu0  ;;  %v5663_v59 = vpop.eup %5662  ;;  %v4867_v34 = vadd.f32 %v4866_v57, %v4865_v55 }
 0x4a3   :  { %v4123_v62 = vadd.f32 %v4845_v54, %v2682_v53  ;;  %v4868_v63 = vpop.f32.mrf.mxu1 }
 0x4a4   :  { %v5665_v0 = vpop.eup %5664  ;;  %v4847_v36 = vpop.f32.mrf.mxu0 }
 0x4a5   :  { %v4163_v1 = vadd.f32 %v4867_v34, %v4123_v62  ;;  %v4869_v2 = vpop.f32.mrf.mxu1  ;;  %v4825_v3 = vpack.c.bf16 %v5665_v0, %v5663_v59 }
 0x4a7   :  { %v4818_v4 = vmul.f32 -1.442695, %v4163_v1  ;;  %4241 = vst [vmem:[#allocation2 + $0x10] sm:$0xff] %v4825_v3 }
 0x4a9   :  { %5666 = vpow2.f32 %v4818_v4 }
 0x4b6   :  { %v5667_v33 = vpop.eup %5666 }
 0x4b7   :  { %v4195_v5 = vadd.f32 1.0, %v5667_v33 }
 0x4b9   :  { %5668 = vrcp.f32 %v4195_v5 }
 0x4c6   :  { %v5669_v41 = vpop.eup %5668 }
 0x4c7   :  { %v4826_v8 = vpack.c.bf16 %v5669_v41, %v5669_v41 }
 0x4c9   :  { %4243 = vst.msk [vmem:[#allocation2 + $0x18] sm:$0xf] %vm4242_vm1, %v4826_v8 }
 0x4ca   :  { %5722 = shalt.err (!%p5719_p0)
}
 0x4cb   :  { %4255 = dma.vmem_to_hbm [thread:$0]  %s4253_s16, 448, %s7501_s10, [#allocation3]  }
 0x4cc   :  { %5731 = dma.done.wait [#allocation3], 448  }
 0x4cd   :  { %5732 = vsyncadd [#allocation3], 4294966848 }
 0x4ce   :  { %5733 = dma.done.wait [#allocation5], 256  }
 0x4cf   :  { %5734 = vsyncadd [#allocation5], 4294967040 }
 0x4d0   :  { %4285 = vsyncpa [#allocation3], 1 }
 0x4d1   :  { %4286 = vsyncpa [#allocation5], 1 }

</bundles_post_ra>
